<compile_context>
chip_gen: v7x
topology: tpu7x:2x2x1
jax: 0.10.0
libtpu: 0.0.40
codegen_flags: <defaults>
</compile_context>

<pallas_src>
import functools

import jax
import jax.numpy as jnp
from jax.experimental import pallas as pl
from jax.experimental.pallas import tpu as pltpu


def _round_up(x, m):
    return (x + m - 1) // m * m


def _pick_vmem_limit_bytes():
    """~7/8 of physical per-core VMEM: 112 MiB on v5e/v6e, 56 MiB on v7x."""
    cap = 128 * 1024 * 1024
    try:
        info = pltpu.get_tpu_info()
        cap = int(getattr(info, "vmem_capacity_bytes", cap)) or cap
    except Exception:
        pass
    return cap - cap // 8


def _hf_kernel(l_ref, a_ref, xk_ref, xrow_ref, out_ref,
               preds_ref, local_ref, a_vmem_ref,
               *, inv, alpha, tm, tk, n_pad, niter):
    t = pl.program_id(0)          # power-iteration step (0 == prologue)
    i = pl.program_id(1)          # output row tile
    k = pl.program_id(2)          # contraction tile
    nk = pl.num_programs(2)

    row = pl.multiple_of(i * tm, tm)
    col = pl.multiple_of(k * tk, tk)

    @pl.when(t == 0)
    def _prologue_dot():
        # out_ref (resident across k) accumulates (beta/(ab+1)*L_hat) @ x
        part = jnp.dot(l_ref[...], xk_ref[...],
                       preferred_element_type=jnp.float32)

        @pl.when(k == 0)
        def _():
            out_ref[...] = part

        @pl.when(k > 0)
        def _():
            out_ref[...] += part

    @pl.when(t == 1)
    def _cache_a():
        # First power iteration: persist the streamed A_hat tile in VMEM so
        # iterations t >= 2 never touch HBM for A_hat again.
        a_vmem_ref[pl.ds(row, tm), pl.ds(col, tk)] = a_ref[...]

    @pl.when(t > 0)
    def _power_dot():
        # out += A_hat[rows, ktile] @ preds_{t-1}[ktile]   (A_hat from VMEM)
        read_slot = 1 - (t % 2)
        off = pl.multiple_of(read_slot * n_pad + k * tk, tk)
        p_prev = preds_ref[pl.ds(off, tk), :]             # bf16 already
        a_tile = a_vmem_ref[pl.ds(row, tm), pl.ds(col, tk)]
        part = jnp.dot(a_tile, p_prev, preferred_element_type=jnp.float32)

        @pl.when(k == 0)
        def _():
            out_ref[...] = part

        @pl.when(k > 0)
        def _():
            out_ref[...] += part

    @pl.when(k == nk - 1)
    def _finalize():
        write_slot = t % 2
        woff = pl.multiple_of(write_slot * n_pad + i * tm, tm)

        @pl.when(t == 0)
        def _():
            p0 = out_ref[...] + inv * xrow_ref[...]
            local_ref[pl.ds(row, tm), :] = alpha * p0
            preds_ref[pl.ds(woff, tm), :] = p0.astype(preds_ref.dtype)
            # Needed when niter == 0 (t == 0 is then the final iteration);
            # harmless otherwise (block (0,0) is never written back mid-run).
            out_ref[...] = p0

        @pl.when(t > 0)
        def _():
            p = out_ref[...] + local_ref[pl.ds(row, tm), :]
            preds_ref[pl.ds(woff, tm), :] = p.astype(preds_ref.dtype)

            @pl.when(t == niter)
            def _():
                out_ref[...] = p


def hf_power_iteration(l_hat, a_hat, local_preds, *, alpha, beta, niter):
    """Pallas wrapper. l_hat/a_hat: (N, N) dense, local_preds: (N, F)."""
    n, f = local_preds.shape
    inv = 1.0 / (alpha * beta + 1.0)

    # Pad: rows/contraction to multiples of 256 (MXU-aligned tiles),
    # features to multiples of 128 (lane-dense stores).
    n_pad = _round_up(n, 256)
    f_pad = _round_up(f, 128)
    tm = 256
    tk = 512 if n_pad % 512 == 0 else 256   # v5e native K granularity is 256

    # Fold beta/(ab+1) into L_hat on the host; bf16 matrices for the MXU.
    l_scaled = (beta * inv) * l_hat.astype(jnp.float32)
    l_scaled = jnp.pad(
        l_scaled, ((0, n_pad - n), (0, n_pad - n))).astype(jnp.bfloat16)
    a_pad = jnp.pad(
        a_hat.astype(jnp.float32),
        ((0, n_pad - n), (0, n_pad - n))).astype(jnp.bfloat16)
    x_pad = jnp.pad(local_preds.astype(jnp.float32),
                    ((0, n_pad - n), (0, f_pad - f)))
    x_bf = x_pad.astype(jnp.bfloat16)        # contraction-view operand

    vmem_limit = _pick_vmem_limit_bytes()
    scratch_bytes = (2 * n_pad * f_pad * 2      # preds ping-pong (bf16)
                     + n_pad * f_pad * 4        # local (f32)
                     + n_pad * n_pad * 2)       # A_hat resident copy (bf16)
    if scratch_bytes > vmem_limit - (8 << 20):
        raise ValueError(
            f"VMEM-resident design needs {scratch_bytes/2**20:.1f} MiB scratch "
            f"(> limit {vmem_limit/2**20:.1f} MiB); this N/F needs the HBM-"
            "staged variant (see TODO in module docstring).")

    grid = (niter + 1, n_pad // tm, n_pad // tk)

    kernel = functools.partial(_hf_kernel, inv=inv, alpha=alpha,
                               tm=tm, tk=tk, n_pad=n_pad, niter=niter)

    # L_hat is only streamed at t == 0; A_hat only at t == 1 (then it lives in
    # VMEM).  Clamping block indices on unused iterations avoids re-reading
    # N^2 bytes of HBM on every other t.
    def l_map(t, i, k):
        on = t == 0
        return (jnp.where(on, i, 0), jnp.where(on, k, 0))

    def a_map(t, i, k):
        on = t == 1
        return (jnp.where(on, i, 0), jnp.where(on, k, 0))

    def xk_map(t, i, k):
        return (jnp.where(t == 0, k, 0), 0)

    def xrow_map(t, i, k):
        return (jnp.where(t == 0, i, 0), 0)

    def out_map(t, i, k):
        # Output only materializes to HBM on the final iteration; for t<niter
        # the clamped index keeps the block resident (it doubles as the k-axis
        # accumulator) and avoids (niter)*N*F writeback traffic.
        return (jnp.where(t == niter, i, 0), 0)

    out = pl.pallas_call(
        kernel,
        out_shape=jax.ShapeDtypeStruct((n_pad, f_pad), jnp.float32),
        grid_spec=pltpu.PrefetchScalarGridSpec(
            num_scalar_prefetch=0,
            grid=grid,
            in_specs=[
                pl.BlockSpec((tm, tk), l_map),          # scaled L_hat (bf16)
                pl.BlockSpec((tm, tk), a_map),          # A_hat (bf16)
                pl.BlockSpec((tk, f_pad), xk_map),      # x (bf16), contraction
                pl.BlockSpec((tm, f_pad), xrow_map),    # x (f32), row view
            ],
            out_specs=pl.BlockSpec((tm, f_pad), out_map),
            scratch_shapes=[
                pltpu.VMEM((2 * n_pad, f_pad), jnp.bfloat16),  # preds ping-pong
                pltpu.VMEM((n_pad, f_pad), jnp.float32),       # local = a*preds0
                pltpu.VMEM((n_pad, n_pad), jnp.bfloat16),      # A_hat resident
            ],
        ),
        compiler_params=pltpu.CompilerParams(
            # MUST stay all-"arbitrary": preds/A_hat live in per-core VMEM
            # scratch and carry data across t/i/k, so the grid is sequential.
            dimension_semantics=("arbitrary", "arbitrary", "arbitrary"),
            vmem_limit_bytes=vmem_limit),
    )(l_scaled, a_pad, x_bf, x_pad)

    return out[:n, :f].astype(local_preds.dtype)


def _build_graph_matrices(key, nnodes, alpha, beta):
    """Deterministic synthetic adjacency -> (L_hat, A_hat) dense, matching
    HFPowerIteration.__init__ / _calc_A_hat semantics."""
    upper = (jax.random.uniform(key, (nnodes, nnodes)) < 0.2).astype(jnp.float32)
    adj = jnp.triu(upper, k=1)
    adj = adj + adj.T

    a = adj + jnp.eye(nnodes, dtype=jnp.float32)          # A + I
    d_vec = jnp.sum(a, axis=1)
    d_invsqrt = 1.0 / jnp.sqrt(d_vec)
    m = d_invsqrt[:, None] * a * d_invsqrt[None, :]       # D^-1/2 (A+I) D^-1/2

    l_hat = jnp.eye(nnodes, dtype=jnp.float32) - m
    a_hat = (alpha * beta + 1.0 - alpha) / (alpha * beta + 1.0) * m
    return l_hat, a_hat


def _reference_f32(l_hat, a_hat, x, alpha, beta, niter):
    inv = 1.0 / (alpha * beta + 1.0)
    hp = jax.lax.Precision.HIGHEST
    preds = inv * x + (beta * inv) * jnp.dot(l_hat, x, precision=hp)
    local = alpha * preds
    for _ in range(niter):
        preds = jnp.dot(a_hat, preds, precision=hp) + local
    return preds


def _reference_bf16(l_hat, a_hat, x, alpha, beta, niter):
    """Mirrors the kernel's bf16 MXU operands with f32 accumulation."""
    inv = 1.0 / (alpha * beta + 1.0)
    hp = jax.lax.Precision.HIGHEST
    l_s = ((beta * inv) * l_hat).astype(jnp.bfloat16).astype(jnp.float32)
    a_b = a_hat.astype(jnp.bfloat16).astype(jnp.float32)
    xb = x.astype(jnp.bfloat16).astype(jnp.float32)
    preds = inv * x + jnp.dot(l_s, xb, precision=hp)
    local = alpha * preds
    for _ in range(niter):
        pb = preds.astype(jnp.bfloat16).astype(jnp.float32)
        preds = jnp.dot(a_b, pb, precision=hp) + local
    return preds


if __name__ == "__main__":
    alpha = 0.1
    beta = 0.5
    niter = 4
    nnodes = 64
    nfeat = 32

    key = jax.random.PRNGKey(0)
    k_adj, k_x = jax.random.split(key)

    l_hat, a_hat = _build_graph_matrices(k_adj, nnodes, alpha, beta)
    local_preds = jax.random.normal(k_x, (nnodes, nfeat), dtype=jnp.float32)
    # idx argument of forward() does not affect the computation; omitted.

    out = hf_power_iteration(l_hat, a_hat, local_preds,
                             alpha=alpha, beta=beta, niter=niter)
    out = jax.block_until_ready(out)

    ref_bf16 = _reference_bf16(l_hat, a_hat, local_preds, alpha, beta, niter)
    ref_f32 = _reference_f32(l_hat, a_hat, local_preds, alpha, beta, niter)

    assert out.shape == (nnodes, nfeat)
    # Tight check against a reference that uses the same bf16 matrix operands.
    assert jnp.allclose(out, ref_bf16, atol=2e-3, rtol=2e-3), \
        float(jnp.max(jnp.abs(out - ref_bf16)))
    # Loose sanity check against the pure-f32 module semantics.
    assert jnp.allclose(out, ref_f32, atol=5e-2, rtol=5e-2), \
        float(jnp.max(jnp.abs(out - ref_f32)))

    print("KERNEL_OK")
</pallas_src>

<mosaic_0001>
module attributes {stable_mosaic.version = 11 : i64} {
  func.func @_hf_kernel(%arg0: i32, %arg1: i32, %arg2: i32, %arg3: memref<256x256xbf16, #tpu.memory_space<vmem>>, %arg4: memref<256x256xbf16, #tpu.memory_space<vmem>>, %arg5: memref<256x128xbf16, #tpu.memory_space<vmem>>, %arg6: memref<256x128xf32, #tpu.memory_space<vmem>>, %arg7: memref<256x128xf32, #tpu.memory_space<vmem>>, %arg8: memref<512x128xbf16, #tpu.memory_space<vmem>>, %arg9: memref<256x128xf32, #tpu.memory_space<vmem>>, %arg10: memref<256x256xbf16, #tpu.memory_space<vmem>>) attributes {dimension_semantics = [#tpu.dimension_semantics<arbitrary>, #tpu.dimension_semantics<arbitrary>, #tpu.dimension_semantics<arbitrary>], iteration_bounds = array<i64: 5, 1, 1>, scalar_prefetch = 0 : i64, scratch_operands = 3 : i64, tpu.core_type = #tpu.core_type<tc>, window_params = [{transform_indices = @transform_0, window_bounds = array<i64: 256, 256>}, {transform_indices = @transform_1, window_bounds = array<i64: 256, 256>}, {transform_indices = @transform_2, window_bounds = array<i64: 256, 128>}, {transform_indices = @transform_3, window_bounds = array<i64: 256, 128>}, {transform_indices = @transform_4, window_bounds = array<i64: 256, 128>}]} {
    %c256_i32 = arith.constant 256 : i32
    %0 = arith.muli %arg1, %c256_i32 : i32
    %1 = tpu.assume_multiple %0, 256 : i32
    %c256_i32_0 = arith.constant 256 : i32
    %2 = arith.muli %arg2, %c256_i32_0 : i32
    %3 = tpu.assume_multiple %2, 256 : i32
    %c0_i32 = arith.constant 0 : i32
    %4 = arith.cmpi eq, %arg0, %c0_i32 : i32
    %5 = arith.extui %4 : i1 to i32
    %c0_i32_1 = arith.constant 0 : i32
    %6 = arith.cmpi ne, %5, %c0_i32_1 : i32
    scf.if %6 {
      %c0 = arith.constant 0 : index
      %c0_7 = arith.constant 0 : index
      %16 = vector.load %arg3[%c0, %c0_7] : memref<256x256xbf16, #tpu.memory_space<vmem>>, vector<256x256xbf16>
      %c0_8 = arith.constant 0 : index
      %c0_9 = arith.constant 0 : index
      %17 = vector.load %arg5[%c0_8, %c0_9] : memref<256x128xbf16, #tpu.memory_space<vmem>>, vector<256x128xbf16>
      %cst = arith.constant dense<0.000000e+00> : vector<256x128xf32>
      %18 = tpu.matmul %16, %17, %cst {dimension_numbers = #tpu.dot_dimension_numbers<[1], [0], [0], [1], [0, 0, 1, 1], [], []>} : vector<256x256xbf16>, vector<256x128xbf16>, vector<256x128xf32> -> vector<256x128xf32>
      %c0_i32_10 = arith.constant 0 : i32
      %19 = arith.cmpi eq, %arg2, %c0_i32_10 : i32
      %20 = arith.extui %19 : i1 to i32
      %c0_i32_11 = arith.constant 0 : i32
      %21 = arith.cmpi ne, %20, %c0_i32_11 : i32
      scf.if %21 {
        %c0_14 = arith.constant 0 : index
        %c0_15 = arith.constant 0 : index
        %25 = vector.load %arg7[%c0_14, %c0_15] : memref<256x128xf32, #tpu.memory_space<vmem>>, vector<256x128xf32>
        tpu.vector_store %arg7[%c0_14, %c0_15], %18 {strides = array<i32>} : memref<256x128xf32, #tpu.memory_space<vmem>>, vector<256x128xf32>,
      } else {
      }
      %c0_i32_12 = arith.constant 0 : i32
      %22 = arith.cmpi sgt, %arg2, %c0_i32_12 : i32
      %23 = arith.extui %22 : i1 to i32
      %c0_i32_13 = arith.constant 0 : i32
      %24 = arith.cmpi ne, %23, %c0_i32_13 : i32
      scf.if %24 {
        %c0_14 = arith.constant 0 : index
        %c0_15 = arith.constant 0 : index
        %25 = vector.load %arg7[%c0_14, %c0_15] : memref<256x128xf32, #tpu.memory_space<vmem>>, vector<256x128xf32>
        %26 = arith.addf %25, %18 : vector<256x128xf32>
        %c0_16 = arith.constant 0 : index
        %c0_17 = arith.constant 0 : index
        %27 = vector.load %arg7[%c0_16, %c0_17] : memref<256x128xf32, #tpu.memory_space<vmem>>, vector<256x128xf32>
        tpu.vector_store %arg7[%c0_16, %c0_17], %26 {strides = array<i32>} : memref<256x128xf32, #tpu.memory_space<vmem>>, vector<256x128xf32>,
      } else {
      }
    } else {
    }
    %c1_i32 = arith.constant 1 : i32
    %7 = arith.cmpi eq, %arg0, %c1_i32 : i32
    %8 = arith.extui %7 : i1 to i32
    %c0_i32_2 = arith.constant 0 : i32
    %9 = arith.cmpi ne, %8, %c0_i32_2 : i32
    scf.if %9 {
      %c0 = arith.constant 0 : index
      %c0_7 = arith.constant 0 : index
      %16 = vector.load %arg4[%c0, %c0_7] : memref<256x256xbf16, #tpu.memory_space<vmem>>, vector<256x256xbf16>
      %17 = arith.index_cast %1 : i32 to index
      %18 = arith.index_cast %3 : i32 to index
      %19 = vector.load %arg10[%17, %18] : memref<256x256xbf16, #tpu.memory_space<vmem>>, vector<256x256xbf16>
      tpu.vector_store %arg10[%17, %18], %16 {strides = array<i32>} : memref<256x256xbf16, #tpu.memory_space<vmem>>, vector<256x256xbf16>,
    } else {
    }
    %c0_i32_3 = arith.constant 0 : i32
    %10 = arith.cmpi sgt, %arg0, %c0_i32_3 : i32
    %11 = arith.extui %10 : i1 to i32
    %c0_i32_4 = arith.constant 0 : i32
    %12 = arith.cmpi ne, %11, %c0_i32_4 : i32
    scf.if %12 {
      %c2_i32 = arith.constant 2 : i32
      %c0_i32_7 = arith.constant 0 : i32
      %16 = arith.cmpi eq, %c2_i32, %c0_i32_7 : i32
      %c1_i32_8 = arith.constant 1 : i32
      %17 = arith.select %16, %c1_i32_8, %c2_i32 : i32
      %18 = arith.remsi %arg0, %17 : i32
      %c0_i32_9 = arith.constant 0 : i32
      %19 = arith.cmpi ne, %18, %c0_i32_9 : i32
      %c0_i32_10 = arith.constant 0 : i32
      %20 = arith.cmpi slt, %18, %c0_i32_10 : i32
      %c0_i32_11 = arith.constant 0 : i32
      %21 = arith.cmpi slt, %17, %c0_i32_11 : i32
      %22 = arith.xori %20, %21 : i1
      %23 = arith.andi %22, %19 : i1
      %24 = arith.addi %18, %17 : i32
      %25 = arith.select %23, %24, %18 : i32
      %c1_i32_12 = arith.constant 1 : i32
      %26 = arith.subi %c1_i32_12, %25 : i32
      %c256_i32_13 = arith.constant 256 : i32
      %27 = arith.muli %26, %c256_i32_13 : i32
      %c256_i32_14 = arith.constant 256 : i32
      %28 = arith.muli %arg2, %c256_i32_14 : i32
      %29 = arith.addi %27, %28 : i32
      %30 = tpu.assume_multiple %29, 256 : i32
      %31 = arith.index_cast %30 : i32 to index
      %c0 = arith.constant 0 : index
      %32 = vector.load %arg8[%31, %c0] : memref<512x128xbf16, #tpu.memory_space<vmem>>, vector<256x128xbf16>
      %33 = arith.index_cast %1 : i32 to index
      %34 = arith.index_cast %3 : i32 to index
      %35 = vector.load %arg10[%33, %34] : memref<256x256xbf16, #tpu.memory_space<vmem>>, vector<256x256xbf16>
      %cst = arith.constant dense<0.000000e+00> : vector<256x128xf32>
      %36 = tpu.matmul %35, %32, %cst {dimension_numbers = #tpu.dot_dimension_numbers<[1], [0], [0], [1], [0, 0, 1, 1], [], []>} : vector<256x256xbf16>, vector<256x128xbf16>, vector<256x128xf32> -> vector<256x128xf32>
      %c0_i32_15 = arith.constant 0 : i32
      %37 = arith.cmpi eq, %arg2, %c0_i32_15 : i32
      %38 = arith.extui %37 : i1 to i32
      %c0_i32_16 = arith.constant 0 : i32
      %39 = arith.cmpi ne, %38, %c0_i32_16 : i32
      scf.if %39 {
        %c0_19 = arith.constant 0 : index
        %c0_20 = arith.constant 0 : index
        %43 = vector.load %arg7[%c0_19, %c0_20] : memref<256x128xf32, #tpu.memory_space<vmem>>, vector<256x128xf32>
        tpu.vector_store %arg7[%c0_19, %c0_20], %36 {strides = array<i32>} : memref<256x128xf32, #tpu.memory_space<vmem>>, vector<256x128xf32>,
      } else {
      }
      %c0_i32_17 = arith.constant 0 : i32
      %40 = arith.cmpi sgt, %arg2, %c0_i32_17 : i32
      %41 = arith.extui %40 : i1 to i32
      %c0_i32_18 = arith.constant 0 : i32
      %42 = arith.cmpi ne, %41, %c0_i32_18 : i32
      scf.if %42 {
        %c0_19 = arith.constant 0 : index
        %c0_20 = arith.constant 0 : index
        %43 = vector.load %arg7[%c0_19, %c0_20] : memref<256x128xf32, #tpu.memory_space<vmem>>, vector<256x128xf32>
        %44 = arith.addf %43, %36 : vector<256x128xf32>
        %c0_21 = arith.constant 0 : index
        %c0_22 = arith.constant 0 : index
        %45 = vector.load %arg7[%c0_21, %c0_22] : memref<256x128xf32, #tpu.memory_space<vmem>>, vector<256x128xf32>
        tpu.vector_store %arg7[%c0_21, %c0_22], %44 {strides = array<i32>} : memref<256x128xf32, #tpu.memory_space<vmem>>, vector<256x128xf32>,
      } else {
      }
    } else {
    }
    %c0_i32_5 = arith.constant 0 : i32
    %13 = arith.cmpi eq, %arg2, %c0_i32_5 : i32
    %14 = arith.extui %13 : i1 to i32
    %c0_i32_6 = arith.constant 0 : i32
    %15 = arith.cmpi ne, %14, %c0_i32_6 : i32
    scf.if %15 {
      %c2_i32 = arith.constant 2 : i32
      %c0_i32_7 = arith.constant 0 : i32
      %16 = arith.cmpi eq, %c2_i32, %c0_i32_7 : i32
      %c1_i32_8 = arith.constant 1 : i32
      %17 = arith.select %16, %c1_i32_8, %c2_i32 : i32
      %18 = arith.remsi %arg0, %17 : i32
      %c0_i32_9 = arith.constant 0 : i32
      %19 = arith.cmpi ne, %18, %c0_i32_9 : i32
      %c0_i32_10 = arith.constant 0 : i32
      %20 = arith.cmpi slt, %18, %c0_i32_10 : i32
      %c0_i32_11 = arith.constant 0 : i32
      %21 = arith.cmpi slt, %17, %c0_i32_11 : i32
      %22 = arith.xori %20, %21 : i1
      %23 = arith.andi %22, %19 : i1
      %24 = arith.addi %18, %17 : i32
      %25 = arith.select %23, %24, %18 : i32
      %c256_i32_12 = arith.constant 256 : i32
      %26 = arith.muli %25, %c256_i32_12 : i32
      %c256_i32_13 = arith.constant 256 : i32
      %27 = arith.muli %arg1, %c256_i32_13 : i32
      %28 = arith.addi %26, %27 : i32
      %29 = tpu.assume_multiple %28, 256 : i32
      %c0_i32_14 = arith.constant 0 : i32
      %30 = arith.cmpi eq, %arg0, %c0_i32_14 : i32
      %31 = arith.extui %30 : i1 to i32
      %c0_i32_15 = arith.constant 0 : i32
      %32 = arith.cmpi ne, %31, %c0_i32_15 : i32
      scf.if %32 {
        %c0 = arith.constant 0 : index
        %c0_18 = arith.constant 0 : index
        %36 = vector.load %arg7[%c0, %c0_18] : memref<256x128xf32, #tpu.memory_space<vmem>>, vector<256x128xf32>
        %c0_19 = arith.constant 0 : index
        %c0_20 = arith.constant 0 : index
        %37 = vector.load %arg6[%c0_19, %c0_20] : memref<256x128xf32, #tpu.memory_space<vmem>>, vector<256x128xf32>
        %cst = arith.constant 0.952380955 : f32
        %38 = vector.broadcast %cst : f32 to vector<256x128xf32>
        %39 = arith.mulf %38, %37 : vector<256x128xf32>
        %40 = arith.addf %36, %39 : vector<256x128xf32>
        %cst_21 = arith.constant 1.000000e-01 : f32
        %41 = vector.broadcast %cst_21 : f32 to vector<256x128xf32>
        %42 = arith.mulf %41, %40 : vector<256x128xf32>
        %43 = arith.index_cast %1 : i32 to index
        %c0_22 = arith.constant 0 : index
        %44 = vector.load %arg9[%43, %c0_22] : memref<256x128xf32, #tpu.memory_space<vmem>>, vector<256x128xf32>
        tpu.vector_store %arg9[%43, %c0_22], %42 {strides = array<i32>} : memref<256x128xf32, #tpu.memory_space<vmem>>, vector<256x128xf32>,
        %45 = arith.truncf %40 : vector<256x128xf32> to vector<256x128xbf16>
        %46 = arith.index_cast %29 : i32 to index
        %c0_23 = arith.constant 0 : index
        %47 = vector.load %arg8[%46, %c0_23] : memref<512x128xbf16, #tpu.memory_space<vmem>>, vector<256x128xbf16>
        tpu.vector_store %arg8[%46, %c0_23], %45 {strides = array<i32>} : memref<512x128xbf16, #tpu.memory_space<vmem>>, vector<256x128xbf16>,
        %c0_24 = arith.constant 0 : index
        %c0_25 = arith.constant 0 : index
        %48 = vector.load %arg7[%c0_24, %c0_25] : memref<256x128xf32, #tpu.memory_space<vmem>>, vector<256x128xf32>
        tpu.vector_store %arg7[%c0_24, %c0_25], %40 {strides = array<i32>} : memref<256x128xf32, #tpu.memory_space<vmem>>, vector<256x128xf32>,
      } else {
      }
      %c0_i32_16 = arith.constant 0 : i32
      %33 = arith.cmpi sgt, %arg0, %c0_i32_16 : i32
      %34 = arith.extui %33 : i1 to i32
      %c0_i32_17 = arith.constant 0 : i32
      %35 = arith.cmpi ne, %34, %c0_i32_17 : i32
      scf.if %35 {
        %c0 = arith.constant 0 : index
        %c0_18 = arith.constant 0 : index
        %36 = vector.load %arg7[%c0, %c0_18] : memref<256x128xf32, #tpu.memory_space<vmem>>, vector<256x128xf32>
        %37 = arith.index_cast %1 : i32 to index
        %c0_19 = arith.constant 0 : index
        %38 = vector.load %arg9[%37, %c0_19] : memref<256x128xf32, #tpu.memory_space<vmem>>, vector<256x128xf32>
        %39 = arith.addf %36, %38 : vector<256x128xf32>
        %40 = arith.truncf %39 : vector<256x128xf32> to vector<256x128xbf16>
        %41 = arith.index_cast %29 : i32 to index
        %c0_20 = arith.constant 0 : index
        %42 = vector.load %arg8[%41, %c0_20] : memref<512x128xbf16, #tpu.memory_space<vmem>>, vector<256x128xbf16>
        tpu.vector_store %arg8[%41, %c0_20], %40 {strides = array<i32>} : memref<512x128xbf16, #tpu.memory_space<vmem>>, vector<256x128xbf16>,
        %c4_i32 = arith.constant 4 : i32
        %43 = arith.cmpi eq, %arg0, %c4_i32 : i32
        %44 = arith.extui %43 : i1 to i32
        %c0_i32_21 = arith.constant 0 : i32
        %45 = arith.cmpi ne, %44, %c0_i32_21 : i32
        scf.if %45 {
          %c0_22 = arith.constant 0 : index
          %c0_23 = arith.constant 0 : index
          %46 = vector.load %arg7[%c0_22, %c0_23] : memref<256x128xf32, #tpu.memory_space<vmem>>, vector<256x128xf32>
          tpu.vector_store %arg7[%c0_22, %c0_23], %39 {strides = array<i32>} : memref<256x128xf32, #tpu.memory_space<vmem>>, vector<256x128xf32>,
        } else {
        }
      } else {
      }
    } else {
    }
    return
  }
  func.func @transform_0(%arg0: i32, %arg1: i32, %arg2: i32) -> (i32, i32) {
    %c0_i32 = arith.constant 0 : i32
    %0 = arith.cmpi eq, %arg0, %c0_i32 : i32
    %c0_i32_0 = arith.constant 0 : i32
    %1 = arith.select %0, %arg1, %c0_i32_0 : i32
    %c0_i32_1 = arith.constant 0 : i32
    %2 = arith.select %0, %arg2, %c0_i32_1 : i32
    %c0_i32_2 = arith.constant 0 : i32
    return %1, %2 : i32, i32
  }
  func.func @transform_1(%arg0: i32, %arg1: i32, %arg2: i32) -> (i32, i32) {
    %c1_i32 = arith.constant 1 : i32
    %0 = arith.cmpi eq, %arg0, %c1_i32 : i32
    %c0_i32 = arith.constant 0 : i32
    %1 = arith.select %0, %arg1, %c0_i32 : i32
    %c0_i32_0 = arith.constant 0 : i32
    %2 = arith.select %0, %arg2, %c0_i32_0 : i32
    %c0_i32_1 = arith.constant 0 : i32
    return %1, %2 : i32, i32
  }
  func.func @transform_2(%arg0: i32, %arg1: i32, %arg2: i32) -> (i32, i32) {
    %c0_i32 = arith.constant 0 : i32
    %0 = arith.cmpi eq, %arg0, %c0_i32 : i32
    %c0_i32_0 = arith.constant 0 : i32
    %1 = arith.select %0, %arg2, %c0_i32_0 : i32
    %c0_i32_1 = arith.constant 0 : i32
    %c0_i32_2 = arith.constant 0 : i32
    return %1, %c0_i32_1 : i32, i32
  }
  func.func @transform_3(%arg0: i32, %arg1: i32, %arg2: i32) -> (i32, i32) {
    %c0_i32 = arith.constant 0 : i32
    %0 = arith.cmpi eq, %arg0, %c0_i32 : i32
    %c0_i32_0 = arith.constant 0 : i32
    %1 = arith.select %0, %arg1, %c0_i32_0 : i32
    %c0_i32_1 = arith.constant 0 : i32
    %c0_i32_2 = arith.constant 0 : i32
    return %1, %c0_i32_1 : i32, i32
  }
  func.func @transform_4(%arg0: i32, %arg1: i32, %arg2: i32) -> (i32, i32) {
    %c4_i32 = arith.constant 4 : i32
    %0 = arith.cmpi eq, %arg0, %c4_i32 : i32
    %c0_i32 = arith.constant 0 : i32
    %1 = arith.select %0, %arg1, %c0_i32 : i32
    %c0_i32_0 = arith.constant 0 : i32
    %c0_i32_1 = arith.constant 0 : i32
    return %1, %c0_i32_0 : i32, i32
  }
}

</mosaic_0001>

<bundles_post_ra>
// kernel: tpu_custom_call.1
= control target key start
LH: loop header
LB: loop body
LE: loop exit
PB: predicated region body
PF: predicated region fallthrough
CT: control target
= control target key end

     0   :  { %9 = vsyncpa [#allocation6], 0  ;;  %s3410_s0 = inlined_call_operand.hbm [shape: bf16[256,256], index: 0, kind: input, shape index: {}]   ;;  %s3411_s1 = inlined_call_operand.hbm [shape: bf16[256,256], index: 1, kind: input, shape index: {}]   ;;  %s3412_s2 = inlined_call_operand.hbm [shape: bf16[256,128], index: 2, kind: input, shape index: {}]   ;;  %s3413_s3 = inlined_call_operand.hbm [shape: f32[256,128], index: 3, kind: input, shape index: {}]   ;;  %s3414_s4 = inlined_call_operand.hbm [shape: f32[256,128], index: 4, kind: output, shape index: {}]  }
   0x1   :  { %11 = vsyncpa [#allocation6 + $0x1], 0 }
   0x2   :  { %12 = vsyncpa [#allocation9], 0 }
   0x3   :  { %14 = vsyncpa [#allocation9 + $0x1], 0 }
   0x4   :  { %15 = vsyncpa [#allocation12], 0 }
   0x5   :  { %17 = vsyncpa [#allocation12 + $0x1], 0 }
   0x6   :  { %18 = vsyncpa [#allocation7], 0 }
   0x7   :  { %20 = vsyncpa [#allocation7 + $0x1], 0  ;;  %s3075_s15 = smov 0   ;;  %s3077_s16 = smov 0  }
   0x8   :  { %s3079_s17 = smov 0  }
   0x9 LB: > { %s3091_s18 = sadd.s32 4294967295, %s3037_s17   ;;  %s2296_s19 = sadd.s32 4294967294, %s3037_s17   ;;  %s3037_s17 = sphi %s3079_s17, %s26_s17   ;;  %s3033_s16 = sphi %s3077_s16, %s3421_s16   ;;  %s3029_s15 = sphi %s3075_s15, %s3420_s15  }
   0xa   : > { %p2702_p0 = scmp.lt.s32.totalorder %s3037_s17, 5  ;;  %p2703_p1 = scmp.eq.s32.totalorder %s3037_s17, 0 }
   0xb   : > { %s248_s20 = sand.u32 1, %s3037_s17   ;;  %s3039_s22 = smov [#allocation8]  }
   0xc   : > { %p3097_p2 = pnand %p2703_p1, %p2702_p0  ;;  %s265_s23 = sshll.u32 %s3039_s22, 4  ;;  %s266_s23 = int_to_ptr.vmem [resolvable:$true] %s265_s23 }
   0xd   : > { %s3102_s24 = scalar_lea.sflag [#allocation9], %s248_s20  ;;  %s2861_s27 = scalar_lea.hbm %s3411_s1, 4096 }
   0xe   : > { %p2862_p4 = scmp.ne.s32.totalorder %s3411_s1, %s2861_s27  ;;  %p3112_p5 = pneg %p3097_p2 }
   0xf   : > { %p2868_p8 = scmp.lt.u32.totalorder %s2861_s27, %s3411_s1 }
  0x10   : > { %p2864_p6 = pnand %p3112_p5, %p2862_p4 }
  0x12   : > { %p2865_p7 = pneg %p2864_p6 }
  0x14   : > { %p2870_p9 = pnand %p2868_p8, %p2865_p7 }
  0x16   : > { %2873 = shalt.err (!%p2870_p9)
}
  0x17   : > { %s2874_s7 = scalar_lea.vmem %s266_s23, 4096  ;;  %s2881_s8 = scalar_lea.vmem %s266_s23, 8192 }
  0x18   : > { %p2875_p10 = scmp.ne.s32.totalorder %s266_s23, %s2874_s7  ;;  %p2882_p13 = scmp.lt.s32.totalorder %s266_s23, %s266_s23 }
  0x19   : > { %p2883_p0 = scmp.lt.s32.totalorder %s2881_s8, %s2874_s7 }
  0x1a   : > { %p2877_p11 = pnand %p2875_p10, %p3112_p5 }
  0x1b   : > { %p2884_p1 = por %p2883_p0, %p2882_p13 }
  0x1c   : > { %p2878_p12 = pneg %p2877_p11 }
  0x1e   : > { %p2885_p3 = pnand %p2884_p1, %p2878_p12 }
  0x20   : > { %2888 = shalt.err (!%p2885_p3)
}
  0x21   : > { %s3040_s9 = smov 128   ;;  %s3041_s10 = smov 8  }
  0x22   : > { %2691 = dma.hbm_to_vmem [thread:$0]  (!%p3097_p2), %s3411_s1, 4096, %s266_s23, %s3102_s24, %s3040_s9, %s3040_s9, %s3041_s10  }
  0x23   : > { %p319_p4 = scmp.lt.s32.totalorder %s3037_s17, 6  ;;  %p3417_p6 = scmp.ge.s32.totalorder %s3037_s17, 1 }
  0x24   : > { %s45_s14 = sadd.s32 1, %s3033_s16  ;;  %s3042_s20 = smov [#allocation5]  }
  0x25   : > { %p3135_p7 = pnand %p3417_p6, %p319_p4  ;;  %p47_p3 = scmp.ge.s32.totalorder %s45_s14, 5 }
  0x26   : > { %s238_s22 = sshll.u32 %s3042_s20, 4  ;;  %s2889_s27 = scalar_lea.hbm %s3410_s0, 4096  ;;  %s239_s22 = int_to_ptr.vmem [resolvable:$true] %s238_s22 }
  0x27   : > { %s3418_s13 = scalar_select %p3135_p7, 1, 0 }
  0x28   : > { %s3423_s14 = smov (%p47_p3, %s45_s14), 0  ;;  %p2890_p8 = scmp.ne.s32.totalorder %s3410_s0, %s2889_s27 }
  0x29   : > { %p2896_p11 = scmp.lt.u32.totalorder %s2889_s27, %s3410_s0 }
  0x2a   : > { %p2892_p9 = pnand %p2890_p8, %p3112_p5 }
  0x2c   : > { %p2893_p10 = pneg %p2892_p9 }
  0x2e   : > { %p2898_p12 = pnand %p2896_p11, %p2893_p10 }
  0x30   : > { %2901 = shalt.err (!%p2898_p12)
}
  0x31   : > { %s2902_s6 = scalar_lea.vmem %s239_s22, 4096  ;;  %s2909_s7 = scalar_lea.vmem %s239_s22, 8192 }
  0x32   : > { %p2903_p13 = scmp.ne.s32.totalorder %s239_s22, %s2902_s6  ;;  %p2910_p4 = scmp.lt.s32.totalorder %s239_s22, %s239_s22 }
  0x33   : > { %p2911_p6 = scmp.lt.s32.totalorder %s2909_s7, %s2902_s6 }
  0x34   : > { %p2905_p0 = pnand %p2903_p13, %p3112_p5 }
  0x35   : > { %p2912_p3 = por %p2911_p6, %p2910_p4 }
  0x36   : > { %p2906_p1 = pneg %p2905_p0 }
  0x38   : > { %p2913_p7 = pnand %p2912_p3, %p2906_p1 }
  0x3a   : > { %2916 = shalt.err (!%p2913_p7)
}
  0x3b   : > { %2688 = dma.hbm_to_vmem [thread:$0]  (!%p3097_p2), %s3410_s0, 4096, %s239_s22, [#allocation6], %s3040_s9, %s3040_s9, %s3041_s10  }
  0x3c   : > { %s3043_s12 = smov [#allocation10]   ;;  %s2917_s27 = scalar_lea.hbm %s3412_s2, 2048 }
  0x3d   : > { %s288_s20 = sshll.u32 %s3043_s12, 4  ;;  %p2918_p7 = scmp.ne.s32.totalorder %s3412_s2, %s2917_s27  ;;  %s289_s20 = int_to_ptr.vmem [resolvable:$true] %s288_s20 }
  0x3e   : > { %p2924_p10 = scmp.lt.u32.totalorder %s2917_s27, %s3412_s2 }
  0x3f   : > { %p2920_p8 = pnand %p2918_p7, %p3112_p5 }
  0x41   : > { %p2921_p9 = pneg %p2920_p8 }
  0x43   : > { %p2926_p11 = pnand %p2924_p10, %p2921_p9 }
  0x45   : > { %2929 = shalt.err (!%p2926_p11)
}
  0x46   : > { %s2930_s22 = scalar_lea.vmem %s289_s20, 2048  ;;  %s2937_s6 = scalar_lea.vmem %s289_s20, 4096 }
  0x47   : > { %p2931_p12 = scmp.ne.s32.totalorder %s289_s20, %s2930_s22  ;;  %p2938_p1 = scmp.lt.s32.totalorder %s289_s20, %s289_s20 }
  0x48   : > { %p2939_p4 = scmp.lt.s32.totalorder %s2937_s6, %s2930_s22 }
  0x49   : > { %p2933_p13 = pnand %p2931_p12, %p3112_p5 }
  0x4a   : > { %p2940_p6 = por %p2939_p4, %p2938_p1 }
  0x4b   : > { %p2934_p0 = pneg %p2933_p13 }
  0x4d   : > { %p2941_p3 = pnand %p2940_p6, %p2934_p0 }
  0x4f   : > { %2944 = shalt.err (!%p2941_p3)
}
  0x50   : > { %s3044_s7 = smov 64   ;;  %s3045_s8 = smov 4  }
  0x51   : > { %2694 = dma.hbm_to_vmem [thread:$0]  (!%p3097_p2), %s3412_s2, 2048, %s289_s20, %s3102_s24, %s3044_s7, %s3044_s7, %s3045_s8  }
  0x52   : > { %s3046_s25 = smov [#allocation11]   ;;  %s2945_s29 = scalar_lea.hbm %s3413_s3, 4096 }
  0x53   : > { %s311_s26 = sshll.u32 %s3046_s25, 4  ;;  %p2946_p7 = scmp.ne.s32.totalorder %s3413_s3, %s2945_s29  ;;  %s312_s26 = int_to_ptr.vmem [resolvable:$true] %s311_s26 }
  0x54   : > { %p2952_p10 = scmp.lt.u32.totalorder %s2945_s29, %s3413_s3 }
  0x55   : > { %p2948_p8 = pnand %p2946_p7, %p3112_p5 }
  0x57   : > { %p2949_p9 = pneg %p2948_p8 }
  0x59   : > { %p2954_p11 = pnand %p2952_p10, %p2949_p9 }
  0x5b   : > { %2957 = shalt.err (!%p2954_p11)
}
  0x5c   : > { %s2958_s24 = scalar_lea.vmem %s312_s26, 4096  ;;  %s2965_s20 = scalar_lea.vmem %s312_s26, 8192 }
  0x5d   : > { %p2959_p12 = scmp.ne.s32.totalorder %s312_s26, %s2958_s24  ;;  %p2966_p1 = scmp.lt.s32.totalorder %s312_s26, %s312_s26 }
  0x5e   : > { %p2967_p4 = scmp.lt.s32.totalorder %s2965_s20, %s2958_s24 }
  0x5f   : > { %p2961_p13 = pnand %p2959_p12, %p3112_p5 }
  0x60   : > { %p2968_p6 = por %p2967_p4, %p2966_p1 }
  0x61   : > { %p2962_p0 = pneg %p2961_p13 }
  0x63   : > { %p2969_p3 = pnand %p2968_p6, %p2962_p0 }
  0x65   : > { %2972 = shalt.err (!%p2969_p3)
}
  0x66   : > { %2697 = dma.hbm_to_vmem [thread:$0]  (!%p3097_p2), %s3413_s3, 4096, %s312_s26, [#allocation12], %s3040_s9, %s3040_s9, %s3041_s10  }
  0x67   : > { %p3419_p7 = scmp.ne.s32.totalorder %s3418_s13, 0 }
  0x68   : > { %p2707_p5 = scmp.eq.s32.totalorder (!%p3419_p7), %s3091_s18, 0 }
  0x69   : > { %323 = sbr.rel (%p3419_p7) target bundleno = 883 (0x373), region = 36 }
  0x70   : > { %3012 = dma.done.wait (%p2707_p5), [#allocation6], 4096  }
  0x71   : > { %3014 = vsyncadd (%p2707_p5), [#allocation6], 4294963200  ;;  %s334_s30 = sand.u32 1, %s3091_s18  }
  0x72   : > { %s335_s11 = scalar_lea.sflag [#allocation9], %s334_s30 }
  0x73   : > { %3016 = dma.done.wait (%p2707_p5), %s335_s11, 6144  }
  0x74   : > { %3018 = vsyncadd (%p2707_p5), %s335_s11, 4294961152 }
  0x75   : > { %3020 = dma.done.wait (%p2707_p5), [#allocation12], 4096  }
  0x76   : > { %3022 = vsyncadd (%p2707_p5), [#allocation12], 4294963200  ;;  %p2308_p8 = scmp.ne.s32.totalorder %s3029_s15, 0 }
  0x77   : > { %v2749_v0 = vld [vmem:[#allocation10 + $0x40] sm:$0xff] (!%p2308_p8)   ;;  %v2751_v2 = vld [vmem:[#allocation10 + $0x48] sm:$0xff] (!%p2308_p8)   ;;  %v2753_v4 = vld [vmem:[#allocation10 + $0x50] sm:$0xff] (!%p2308_p8)  }
  0x78   : > { %421 = sbr.rel (%p2308_p8) target bundleno = 426 (0x1aa), region = 56  ;;  %v2750_v1 = vld [vmem:[#allocation10] sm:$0xff] (!%p2308_p8)   ;;  %2409 = vmatprep.subr.bf16.mxu0 (!%p2308_p8), %v2749_v0  ;;  %2633 = vmatprep.subr.bf16.mxu1 (!%p2308_p8), %v2749_v0  ;;  %v2752_v3 = vld [vmem:[#allocation10 + $0x8] sm:$0xff] (!%p2308_p8)   ;;  %v2754_v5 = vld [vmem:[#allocation10 + $0x10] sm:$0xff] (!%p2308_p8)  }
  0x79   : > { %2410 = vmatpush3.bf16.msra.mxu0 (!%p2308_p8), %v2750_v1  ;;  %2641 = vmatpush3.bf16.msra.mxu1 (!%p2308_p8), %v2750_v1  ;;  %v2755_v6 = vld [vmem:[#allocation10 + $0x58] sm:$0xff] (!%p2308_p8)   ;;  %v2757_v8 = vld [vmem:[#allocation10 + $0x60] sm:$0xff] (!%p2308_p8)   ;;  %v2759_v10 = vld [vmem:[#allocation10 + $0x68] sm:$0xff] (!%p2308_p8)  }
  0x7a   : > { %2411 = vmatprep.subr.bf16.mxu0 (!%p2308_p8), %v2751_v2  ;;  %2634 = vmatprep.subr.bf16.mxu1 (!%p2308_p8), %v2751_v2  ;;  %v2756_v7 = vld [vmem:[#allocation10 + $0x18] sm:$0xff] (!%p2308_p8)   ;;  %v2758_v9 = vld [vmem:[#allocation10 + $0x20] sm:$0xff] (!%p2308_p8)   ;;  %v2760_v13 = vld [vmem:[#allocation10 + $0x28] sm:$0xff] (!%p2308_p8)  }
  0x7b   : > { %v2767_v11 = vld [vmem:[#allocation5 + $0x4] ss:$8 sps:$4 sm:$0xff] (!%p2308_p8)   ;;  %v2761_v14 = vld [vmem:[#allocation10 + $0x70] sm:$0xff] (!%p2308_p8)   ;;  %v2763_v16 = vld [vmem:[#allocation10 + $0x78] sm:$0xff] (!%p2308_p8)  }
  0x7c   : > { %v2770_v12 = vld [vmem:[#allocation5 + $0x84] ss:$8 sps:$4 sm:$0xff] (!%p2308_p8)   ;;  %774 = vmatprep.mubr.bf16.mxu0 (!%p2308_p8), %v2767_v11  ;;  %v2762_v15 = vld [vmem:[#allocation10 + $0x30] sm:$0xff] (!%p2308_p8)   ;;  %v2764_v17 = vld [vmem:[#allocation10 + $0x38] sm:$0xff] (!%p2308_p8)  }
  0x7d   : > { %2412 = vmatpush3.bf16.msra.mxu0 (!%p2308_p8), %v2752_v3  ;;  %2642 = vmatpush3.bf16.msra.mxu1 (!%p2308_p8), %v2752_v3  ;;  %v2765_v18 = vld [vmem:[#allocation5] ss:$8 sps:$4 sm:$0xff] (!%p2308_p8)   ;;  %v2771_v20 = vld [vmem:[#allocation5 + $0x14] ss:$8 sps:$4 sm:$0xff] (!%p2308_p8)   ;;  %v2775_v22 = vld [vmem:[#allocation5 + $0x10] ss:$8 sps:$4 sm:$0xff] (!%p2308_p8)  }
  0x7e   : > { %2413 = vmatprep.subr.bf16.mxu0 (!%p2308_p8), %v2753_v4  ;;  %2635 = vmatprep.subr.bf16.mxu1 (!%p2308_p8), %v2753_v4  ;;  %v2768_v19 = vld [vmem:[#allocation5 + $0x80] ss:$8 sps:$4 sm:$0xff] (!%p2308_p8)   ;;  %v2773_v21 = vld [vmem:[#allocation5 + $0x94] ss:$8 sps:$4 sm:$0xff] (!%p2308_p8)   ;;  %v2776_v23 = vld [vmem:[#allocation5 + $0x90] ss:$8 sps:$4 sm:$0xff] (!%p2308_p8)  }
  0x7f   : > { %838 = vmatprep.mubr.bf16.mxu1 %v2770_v12  ;;  %v2777_v24 = vld [vmem:[#allocation5 + $0x24] ss:$8 sps:$4 sm:$0xff]   ;;  %v2781_v26 = vld [vmem:[#allocation5 + $0x20] ss:$8 sps:$4 sm:$0xff]   ;;  %v2783_v28 = vld [vmem:[#allocation5 + $0x34] ss:$8 sps:$4 sm:$0xff]  }
  0x80   : > { %v2779_v25 = vld [vmem:[#allocation5 + $0xa4] ss:$8 sps:$4 sm:$0xff]   ;;  %v2782_v27 = vld [vmem:[#allocation5 + $0xa0] ss:$8 sps:$4 sm:$0xff]   ;;  %v2785_v29 = vld [vmem:[#allocation5 + $0xb4] ss:$8 sps:$4 sm:$0xff]  }
  0x81   : > { %2414 = vmatpush3.bf16.msra.mxu0 %v2754_v5  ;;  %2643 = vmatpush3.bf16.msra.mxu1 %v2754_v5  ;;  %v2787_v30 = vld [vmem:[#allocation5 + $0x30] ss:$8 sps:$4 sm:$0xff]   ;;  %v2789_v32 = vld [vmem:[#allocation5 + $0x44] ss:$8 sps:$4 sm:$0xff]   ;;  %v2793_v34 = vld [vmem:[#allocation5 + $0x40] ss:$8 sps:$4 sm:$0xff]  }
  0x82   : > { %2415 = vmatprep.subr.bf16.mxu0 %v2755_v6  ;;  %2636 = vmatprep.subr.bf16.mxu1 %v2755_v6  ;;  %v2788_v31 = vld [vmem:[#allocation5 + $0xb0] ss:$8 sps:$4 sm:$0xff]   ;;  %v2791_v33 = vld [vmem:[#allocation5 + $0xc4] ss:$8 sps:$4 sm:$0xff]   ;;  %v2794_v35 = vld [vmem:[#allocation5 + $0xc0] ss:$8 sps:$4 sm:$0xff]  }
  0x83   : > { %v2795_v36 = vld [vmem:[#allocation5 + $0x54] ss:$8 sps:$4 sm:$0xff]   ;;  %v2799_v38 = vld [vmem:[#allocation5 + $0x50] ss:$8 sps:$4 sm:$0xff]   ;;  %v2801_v40 = vld [vmem:[#allocation5 + $0x64] ss:$8 sps:$4 sm:$0xff]  }
  0x84   : > { %v2797_v37 = vld [vmem:[#allocation5 + $0xd4] ss:$8 sps:$4 sm:$0xff]   ;;  %v2800_v39 = vld [vmem:[#allocation5 + $0xd0] ss:$8 sps:$4 sm:$0xff]   ;;  %v2803_v41 = vld [vmem:[#allocation5 + $0xe4] ss:$8 sps:$4 sm:$0xff]  }
  0x85   : > { %2416 = vmatpush3.bf16.msra.mxu0 %v2756_v7  ;;  %2644 = vmatpush3.bf16.msra.mxu1 %v2756_v7  ;;  %v2805_v42 = vld [vmem:[#allocation5 + $0x60] ss:$8 sps:$4 sm:$0xff]   ;;  %v2807_v44 = vld [vmem:[#allocation5 + $0x74] ss:$8 sps:$4 sm:$0xff]   ;;  %v2811_v46 = vld [vmem:[#allocation5 + $0x70] ss:$8 sps:$4 sm:$0xff]  }
  0x86   : > { %2417 = vmatprep.subr.bf16.mxu0 %v2757_v8  ;;  %2637 = vmatprep.subr.bf16.mxu1 %v2757_v8  ;;  %v2806_v43 = vld [vmem:[#allocation5 + $0xe0] ss:$8 sps:$4 sm:$0xff]   ;;  %v2809_v45 = vld [vmem:[#allocation5 + $0xf4] ss:$8 sps:$4 sm:$0xff]   ;;  %v2812_v47 = vld [vmem:[#allocation5 + $0xf0] ss:$8 sps:$4 sm:$0xff]  }
  0x89   : > { %2418 = vmatpush3.bf16.msra.mxu0 %v2758_v9  ;;  %2645 = vmatpush3.bf16.msra.mxu1 %v2758_v9 }
  0x8a   : > { %2419 = vmatprep.subr.bf16.mxu0 %v2759_v10  ;;  %2638 = vmatprep.subr.bf16.mxu1 %v2759_v10 }
  0x8d   : > { %2420 = vmatpush3.bf16.msra.mxu0 %v2760_v13  ;;  %2646 = vmatpush3.bf16.msra.mxu1 %v2760_v13 }
  0x8e   : > { %2421 = vmatprep.subr.bf16.mxu0 %v2761_v14  ;;  %2639 = vmatprep.subr.bf16.mxu1 %v2761_v14 }
  0x91   : > { %2422 = vmatpush3.bf16.msra.mxu0 %v2762_v15  ;;  %2647 = vmatpush3.bf16.msra.mxu1 %v2762_v15 }
  0x92   : > { %2423 = vmatprep.subr.bf16.mxu0 %v2763_v16  ;;  %2640 = vmatprep.subr.bf16.mxu1 %v2763_v16 }
  0x95   : > { %2424 = vmatpush3.bf16.msra.mxu0 %v2764_v17  ;;  %2648 = vmatpush3.bf16.msra.mxu1 %v2764_v17 }
  0x98   : > { %775 = vmatmul.mubr.bf16.vlgmr.msra.gmra.mrb[0].mxu0 %v2765_v18  ;;  %839 = vmatmul.mubr.bf16.vlgmr.msra.gmra.mrb[0].mxu1 %v2768_v19 }
  0x99   : > { %782 = vmatprep.mubr.bf16.mxu0 %v2771_v20  ;;  %846 = vmatprep.mubr.bf16.mxu1 %v2773_v21 }
  0xa0   : > { %783 = vmatmul.mubr.bf16.gmra.mrb[4].mxu0 %v2775_v22  ;;  %847 = vmatmul.mubr.bf16.gmra.mrb[4].mxu1 %v2776_v23 }
  0xa1   : > { %790 = vmatprep.mubr.bf16.mxu0 %v2777_v24  ;;  %854 = vmatprep.mubr.bf16.mxu1 %v2779_v25 }
  0xa8   : > { %791 = vmatmul.mubr.bf16.gmra.mrb[8].mxu0 %v2781_v26  ;;  %855 = vmatmul.mubr.bf16.gmra.mrb[8].mxu1 %v2782_v27 }
  0xa9   : > { %798 = vmatprep.mubr.bf16.mxu0 %v2783_v28  ;;  %862 = vmatprep.mubr.bf16.mxu1 %v2785_v29 }
  0xb0   : > { %799 = vmatmul.mubr.bf16.gmra.mrb[12].mxu0 %v2787_v30  ;;  %863 = vmatmul.mubr.bf16.gmra.mrb[12].mxu1 %v2788_v31 }
  0xb1   : > { %806 = vmatprep.mubr.bf16.mxu0 %v2789_v32  ;;  %870 = vmatprep.mubr.bf16.mxu1 %v2791_v33 }
  0xb8   : > { %807 = vmatmul.mubr.bf16.gmra.mrb[16].mxu0 %v2793_v34  ;;  %871 = vmatmul.mubr.bf16.gmra.mrb[16].mxu1 %v2794_v35 }
  0xb9   : > { %814 = vmatprep.mubr.bf16.mxu0 %v2795_v36  ;;  %878 = vmatprep.mubr.bf16.mxu1 %v2797_v37 }
  0xc0   : > { %815 = vmatmul.mubr.bf16.gmra.mrb[20].mxu0 %v2799_v38  ;;  %879 = vmatmul.mubr.bf16.gmra.mrb[20].mxu1 %v2800_v39 }
  0xc1   : > { %822 = vmatprep.mubr.bf16.mxu0 %v2801_v40  ;;  %886 = vmatprep.mubr.bf16.mxu1 %v2803_v41 }
  0xc8   : > { %823 = vmatmul.mubr.bf16.gmra.mrb[24].mxu0 %v2805_v42  ;;  %887 = vmatmul.mubr.bf16.gmra.mrb[24].mxu1 %v2806_v43 }
  0xc9   : > { %830 = vmatprep.mubr.bf16.mxu0 %v2807_v44  ;;  %894 = vmatprep.mubr.bf16.mxu1 %v2809_v45 }
  0xd0   : > { %831 = vmatmul.mubr.bf16.gmra.mrb[28].mxu0 %v2811_v46  ;;  %895 = vmatmul.mubr.bf16.gmra.mrb[28].mxu1 %v2812_v47 }
 0x16b   : > { %v2425_v48 = vpop.f32.mrb[0].mxu0  ;;  %v2473_v49 = vpop.f32.mrb[0].mxu1 }
 0x16c   : > { %v2426_v50 = vpop.f32.mrb[1].mxu0  ;;  %v2474_v51 = vpop.f32.mrb[1].mxu1 }
 0x16d   : > { %v2427_v52 = vadd.f32 %v2426_v50, %v2425_v48  ;;  %v2475_v53 = vadd.f32 %v2474_v51, %v2473_v49  ;;  %v2428_v54 = vpop.f32.mrb[2].mxu0  ;;  %v2476_v55 = vpop.f32.mrb[2].mxu1 }
 0x16e   : > { %v2429_v56 = vpop.f32.mrb[3].mxu0  ;;  %v2477_v57 = vpop.f32.mrb[3].mxu1 }
 0x16f   : > { %907 = vst [vmem:[#allocation13] sm:$0xff] %v2427_v52  ;;  %923 = vst [vmem:[#allocation13 + $0x80] sm:$0xff] %v2475_v53  ;;  %v2430_v58 = vadd.f32 %v2429_v56, %v2428_v54  ;;  %v2478_v59 = vadd.f32 %v2477_v57, %v2476_v55 }
 0x171   : > { %908 = vst [vmem:[#allocation13 + $0x8] sm:$0xff] %v2430_v58  ;;  %924 = vst [vmem:[#allocation13 + $0x88] sm:$0xff] %v2478_v59 }
 0x173   : > { %v2431_v60 = vpop.f32.mrb[4].mxu0  ;;  %v2479_v61 = vpop.f32.mrb[4].mxu1 }
 0x174   : > { %v2432_v62 = vpop.f32.mrb[5].mxu0  ;;  %v2480_v63 = vpop.f32.mrb[5].mxu1 }
 0x175   : > { %v2433_v0 = vadd.f32 %v2432_v62, %v2431_v60  ;;  %v2481_v1 = vadd.f32 %v2480_v63, %v2479_v61  ;;  %v2434_v2 = vpop.f32.mrb[6].mxu0  ;;  %v2482_v3 = vpop.f32.mrb[6].mxu1 }
 0x176   : > { %v2435_v4 = vpop.f32.mrb[7].mxu0  ;;  %v2483_v5 = vpop.f32.mrb[7].mxu1 }
 0x177   : > { %909 = vst [vmem:[#allocation13 + $0x10] sm:$0xff] %v2433_v0  ;;  %925 = vst [vmem:[#allocation13 + $0x90] sm:$0xff] %v2481_v1  ;;  %v2436_v6 = vadd.f32 %v2435_v4, %v2434_v2  ;;  %v2484_v7 = vadd.f32 %v2483_v5, %v2482_v3 }
 0x179   : > { %910 = vst [vmem:[#allocation13 + $0x18] sm:$0xff] %v2436_v6  ;;  %926 = vst [vmem:[#allocation13 + $0x98] sm:$0xff] %v2484_v7 }
 0x17b   : > { %v2437_v8 = vpop.f32.mrb[8].mxu0  ;;  %v2485_v9 = vpop.f32.mrb[8].mxu1 }
 0x17c   : > { %v2438_v10 = vpop.f32.mrb[9].mxu0  ;;  %v2486_v11 = vpop.f32.mrb[9].mxu1 }
 0x17d   : > { %v2439_v12 = vadd.f32 %v2438_v10, %v2437_v8  ;;  %v2487_v13 = vadd.f32 %v2486_v11, %v2485_v9  ;;  %v2440_v14 = vpop.f32.mrb[10].mxu0  ;;  %v2488_v15 = vpop.f32.mrb[10].mxu1 }
 0x17e   : > { %v2441_v16 = vpop.f32.mrb[11].mxu0  ;;  %v2489_v17 = vpop.f32.mrb[11].mxu1 }
 0x17f   : > { %911 = vst [vmem:[#allocation13 + $0x20] sm:$0xff] %v2439_v12  ;;  %927 = vst [vmem:[#allocation13 + $0xa0] sm:$0xff] %v2487_v13  ;;  %v2442_v18 = vadd.f32 %v2441_v16, %v2440_v14  ;;  %v2490_v19 = vadd.f32 %v2489_v17, %v2488_v15 }
 0x181   : > { %912 = vst [vmem:[#allocation13 + $0x28] sm:$0xff] %v2442_v18  ;;  %928 = vst [vmem:[#allocation13 + $0xa8] sm:$0xff] %v2490_v19 }
 0x183   : > { %v2443_v20 = vpop.f32.mrb[12].mxu0  ;;  %v2491_v21 = vpop.f32.mrb[12].mxu1 }
 0x184   : > { %v2444_v22 = vpop.f32.mrb[13].mxu0  ;;  %v2492_v23 = vpop.f32.mrb[13].mxu1 }
 0x185   : > { %v2445_v24 = vadd.f32 %v2444_v22, %v2443_v20  ;;  %v2493_v25 = vadd.f32 %v2492_v23, %v2491_v21  ;;  %v2446_v26 = vpop.f32.mrb[14].mxu0  ;;  %v2494_v27 = vpop.f32.mrb[14].mxu1 }
 0x186   : > { %v2447_v28 = vpop.f32.mrb[15].mxu0  ;;  %v2495_v29 = vpop.f32.mrb[15].mxu1 }
 0x187   : > { %913 = vst [vmem:[#allocation13 + $0x30] sm:$0xff] %v2445_v24  ;;  %929 = vst [vmem:[#allocation13 + $0xb0] sm:$0xff] %v2493_v25  ;;  %v2448_v30 = vadd.f32 %v2447_v28, %v2446_v26  ;;  %v2496_v31 = vadd.f32 %v2495_v29, %v2494_v27 }
 0x189   : > { %914 = vst [vmem:[#allocation13 + $0x38] sm:$0xff] %v2448_v30  ;;  %930 = vst [vmem:[#allocation13 + $0xb8] sm:$0xff] %v2496_v31 }
 0x18b   : > { %v2449_v32 = vpop.f32.mrb[16].mxu0  ;;  %v2497_v33 = vpop.f32.mrb[16].mxu1 }
 0x18c   : > { %v2450_v34 = vpop.f32.mrb[17].mxu0  ;;  %v2498_v35 = vpop.f32.mrb[17].mxu1 }
 0x18d   : > { %v2451_v36 = vadd.f32 %v2450_v34, %v2449_v32  ;;  %v2499_v37 = vadd.f32 %v2498_v35, %v2497_v33  ;;  %v2452_v38 = vpop.f32.mrb[18].mxu0  ;;  %v2500_v39 = vpop.f32.mrb[18].mxu1 }
 0x18e   : > { %v2453_v40 = vpop.f32.mrb[19].mxu0  ;;  %v2501_v41 = vpop.f32.mrb[19].mxu1 }
 0x18f   : > { %915 = vst [vmem:[#allocation13 + $0x40] sm:$0xff] %v2451_v36  ;;  %931 = vst [vmem:[#allocation13 + $0xc0] sm:$0xff] %v2499_v37  ;;  %v2454_v42 = vadd.f32 %v2453_v40, %v2452_v38  ;;  %v2502_v43 = vadd.f32 %v2501_v41, %v2500_v39 }
 0x191   : > { %916 = vst [vmem:[#allocation13 + $0x48] sm:$0xff] %v2454_v42  ;;  %932 = vst [vmem:[#allocation13 + $0xc8] sm:$0xff] %v2502_v43 }
 0x193   : > { %v2455_v44 = vpop.f32.mrb[20].mxu0  ;;  %v2503_v45 = vpop.f32.mrb[20].mxu1 }
 0x194   : > { %v2456_v46 = vpop.f32.mrb[21].mxu0  ;;  %v2504_v47 = vpop.f32.mrb[21].mxu1 }
 0x195   : > { %v2457_v48 = vadd.f32 %v2456_v46, %v2455_v44  ;;  %v2505_v49 = vadd.f32 %v2504_v47, %v2503_v45  ;;  %v2458_v50 = vpop.f32.mrb[22].mxu0  ;;  %v2506_v51 = vpop.f32.mrb[22].mxu1 }
 0x196   : > { %v2459_v52 = vpop.f32.mrb[23].mxu0  ;;  %v2507_v53 = vpop.f32.mrb[23].mxu1 }
 0x197   : > { %917 = vst [vmem:[#allocation13 + $0x50] sm:$0xff] %v2457_v48  ;;  %933 = vst [vmem:[#allocation13 + $0xd0] sm:$0xff] %v2505_v49  ;;  %v2460_v54 = vadd.f32 %v2459_v52, %v2458_v50  ;;  %v2508_v55 = vadd.f32 %v2507_v53, %v2506_v51 }
 0x199   : > { %918 = vst [vmem:[#allocation13 + $0x58] sm:$0xff] %v2460_v54  ;;  %934 = vst [vmem:[#allocation13 + $0xd8] sm:$0xff] %v2508_v55 }
 0x19b   : > { %v2461_v56 = vpop.f32.mrb[24].mxu0  ;;  %v2509_v57 = vpop.f32.mrb[24].mxu1 }
 0x19c   : > { %v2462_v58 = vpop.f32.mrb[25].mxu0  ;;  %v2510_v59 = vpop.f32.mrb[25].mxu1 }
 0x19d   : > { %v2463_v60 = vadd.f32 %v2462_v58, %v2461_v56  ;;  %v2511_v61 = vadd.f32 %v2510_v59, %v2509_v57  ;;  %v2464_v62 = vpop.f32.mrb[26].mxu0  ;;  %v2512_v63 = vpop.f32.mrb[26].mxu1 }
 0x19e   : > { %v2465_v0 = vpop.f32.mrb[27].mxu0  ;;  %v2513_v1 = vpop.f32.mrb[27].mxu1 }
 0x19f   : > { %919 = vst [vmem:[#allocation13 + $0x60] sm:$0xff] %v2463_v60  ;;  %935 = vst [vmem:[#allocation13 + $0xe0] sm:$0xff] %v2511_v61  ;;  %v2466_v2 = vadd.f32 %v2465_v0, %v2464_v62  ;;  %v2514_v3 = vadd.f32 %v2513_v1, %v2512_v63 }
 0x1a1   : > { %920 = vst [vmem:[#allocation13 + $0x68] sm:$0xff] %v2466_v2  ;;  %936 = vst [vmem:[#allocation13 + $0xe8] sm:$0xff] %v2514_v3 }
 0x1a3   : > { %v2467_v4 = vpop.f32.mrb[28].mxu0  ;;  %v2515_v5 = vpop.f32.mrb[28].mxu1 }
 0x1a4   : > { %v2468_v6 = vpop.f32.mrb[29].mxu0  ;;  %v2516_v7 = vpop.f32.mrb[29].mxu1 }
 0x1a5   : > { %v2469_v8 = vadd.f32 %v2468_v6, %v2467_v4  ;;  %v2517_v9 = vadd.f32 %v2516_v7, %v2515_v5  ;;  %v2470_v10 = vpop.f32.mrb[30].mxu0  ;;  %v2518_v11 = vpop.f32.mrb[30].mxu1 }
 0x1a6   : > { %v2471_v12 = vpop.f32.mrb[31].mxu0  ;;  %v2519_v13 = vpop.f32.mrb[31].mxu1 }
 0x1a7   : > { %921 = vst [vmem:[#allocation13 + $0x70] sm:$0xff] %v2469_v8  ;;  %937 = vst [vmem:[#allocation13 + $0xf0] sm:$0xff] %v2517_v9  ;;  %v2472_v14 = vadd.f32 %v2471_v12, %v2470_v10  ;;  %v2520_v15 = vadd.f32 %v2519_v13, %v2518_v11 }
 0x1a9   : > { %922 = vst [vmem:[#allocation13 + $0x78] sm:$0xff] %v2472_v14  ;;  %938 = vst [vmem:[#allocation13 + $0xf8] sm:$0xff] %v2520_v15 }
 0x1aa PF: > { %p2357_p2 = scmp.ne.s32.totalorder %s3029_s15, 1 }
 0x1ab   : > { %v2813_v16 = vld [vmem:[#allocation8] ss:$8 sps:$4 sm:$0xff] (!%p2357_p2)   ;;  %v2815_v17 = vld [vmem:[#allocation8 + $0x4] ss:$8 sps:$4 sm:$0xff] (!%p2357_p2)   ;;  %v2816_v18 = vld [vmem:[#allocation8 + $0x10] ss:$8 sps:$4 sm:$0xff] (!%p2357_p2)  }
 0x1ac   : > { %1042 = sbr.rel (%p2357_p2) target bundleno = 444 (0x1bc), region = 68  ;;  %1243 = vst [vmem:[#allocation4] sm:$0xff] (!%p2357_p2), %v2813_v16  ;;  %v2818_v19 = vld [vmem:[#allocation8 + $0x14] ss:$8 sps:$4 sm:$0xff] (!%p2357_p2)   ;;  %1244 = vst [vmem:[#allocation4 + $0x8] sm:$0xff] (!%p2357_p2), %v2815_v17 }
 0x1ad   : > { %v2819_v20 = vld [vmem:[#allocation8 + $0x20] ss:$8 sps:$4 sm:$0xff] (!%p2357_p2)   ;;  %v2821_v21 = vld [vmem:[#allocation8 + $0x24] ss:$8 sps:$4 sm:$0xff] (!%p2357_p2)   ;;  %1245 = vst [vmem:[#allocation4 + $0x10] sm:$0xff] (!%p2357_p2), %v2816_v18  ;;  %1246 = vst [vmem:[#allocation4 + $0x18] sm:$0xff] (!%p2357_p2), %v2818_v19 }
 0x1ae   : > { %v2822_v22 = vld [vmem:[#allocation8 + $0x30] ss:$8 sps:$4 sm:$0xff] (!%p2357_p2)   ;;  %1247 = vst [vmem:[#allocation4 + $0x20] sm:$0xff] (!%p2357_p2), %v2819_v20  ;;  %1248 = vst [vmem:[#allocation4 + $0x28] sm:$0xff] (!%p2357_p2), %v2821_v21  ;;  %v2824_v23 = vld [vmem:[#allocation8 + $0x34] ss:$8 sps:$4 sm:$0xff] (!%p2357_p2)  }
 0x1af   : > { %1249 = vst [vmem:[#allocation4 + $0x30] sm:$0xff] (!%p2357_p2), %v2822_v22  ;;  %v2825_v24 = vld [vmem:[#allocation8 + $0x40] ss:$8 sps:$4 sm:$0xff] (!%p2357_p2)   ;;  %v2827_v25 = vld [vmem:[#allocation8 + $0x44] ss:$8 sps:$4 sm:$0xff] (!%p2357_p2)   ;;  %1250 = vst [vmem:[#allocation4 + $0x38] sm:$0xff] (!%p2357_p2), %v2824_v23 }
 0x1b0   : > { %v2828_v26 = vld [vmem:[#allocation8 + $0x50] ss:$8 sps:$4 sm:$0xff] (!%p2357_p2)   ;;  %v2830_v27 = vld [vmem:[#allocation8 + $0x54] ss:$8 sps:$4 sm:$0xff] (!%p2357_p2)   ;;  %1251 = vst [vmem:[#allocation4 + $0x40] sm:$0xff] (!%p2357_p2), %v2825_v24  ;;  %1252 = vst [vmem:[#allocation4 + $0x48] sm:$0xff] (!%p2357_p2), %v2827_v25 }
 0x1b1   : > { %v2831_v28 = vld [vmem:[#allocation8 + $0x60] ss:$8 sps:$4 sm:$0xff] (!%p2357_p2)   ;;  %1253 = vst [vmem:[#allocation4 + $0x50] sm:$0xff] (!%p2357_p2), %v2828_v26  ;;  %1254 = vst [vmem:[#allocation4 + $0x58] sm:$0xff] (!%p2357_p2), %v2830_v27  ;;  %v2833_v29 = vld [vmem:[#allocation8 + $0x64] ss:$8 sps:$4 sm:$0xff] (!%p2357_p2)  }
 0x1b2   : > { %1255 = vst [vmem:[#allocation4 + $0x60] sm:$0xff] (!%p2357_p2), %v2831_v28  ;;  %v2834_v30 = vld [vmem:[#allocation8 + $0x70] ss:$8 sps:$4 sm:$0xff] (!%p2357_p2)   ;;  %v2836_v31 = vld [vmem:[#allocation8 + $0x74] ss:$8 sps:$4 sm:$0xff] (!%p2357_p2)   ;;  %1256 = vst [vmem:[#allocation4 + $0x68] sm:$0xff] (!%p2357_p2), %v2833_v29 }
 0x1b3   : > { %v2837_v32 = vld [vmem:[#allocation8 + $0x80] ss:$8 sps:$4 sm:$0xff]   ;;  %v2839_v33 = vld [vmem:[#allocation8 + $0x84] ss:$8 sps:$4 sm:$0xff]   ;;  %1257 = vst [vmem:[#allocation4 + $0x70] sm:$0xff] %v2834_v30  ;;  %1258 = vst [vmem:[#allocation4 + $0x78] sm:$0xff] %v2836_v31 }
 0x1b4   : > { %v2840_v34 = vld [vmem:[#allocation8 + $0x90] ss:$8 sps:$4 sm:$0xff]   ;;  %1259 = vst [vmem:[#allocation4 + $0x80] sm:$0xff] %v2837_v32  ;;  %1260 = vst [vmem:[#allocation4 + $0x88] sm:$0xff] %v2839_v33  ;;  %v2842_v35 = vld [vmem:[#allocation8 + $0x94] ss:$8 sps:$4 sm:$0xff]  }
 0x1b5   : > { %1261 = vst [vmem:[#allocation4 + $0x90] sm:$0xff] %v2840_v34  ;;  %v2843_v36 = vld [vmem:[#allocation8 + $0xa0] ss:$8 sps:$4 sm:$0xff]   ;;  %v2845_v37 = vld [vmem:[#allocation8 + $0xa4] ss:$8 sps:$4 sm:$0xff]   ;;  %1262 = vst [vmem:[#allocation4 + $0x98] sm:$0xff] %v2842_v35 }
 0x1b6   : > { %v2846_v38 = vld [vmem:[#allocation8 + $0xb0] ss:$8 sps:$4 sm:$0xff]   ;;  %v2848_v39 = vld [vmem:[#allocation8 + $0xb4] ss:$8 sps:$4 sm:$0xff]   ;;  %1263 = vst [vmem:[#allocation4 + $0xa0] sm:$0xff] %v2843_v36  ;;  %1264 = vst [vmem:[#allocation4 + $0xa8] sm:$0xff] %v2845_v37 }
 0x1b7   : > { %v2849_v40 = vld [vmem:[#allocation8 + $0xc0] ss:$8 sps:$4 sm:$0xff]   ;;  %1265 = vst [vmem:[#allocation4 + $0xb0] sm:$0xff] %v2846_v38  ;;  %1266 = vst [vmem:[#allocation4 + $0xb8] sm:$0xff] %v2848_v39  ;;  %v2851_v41 = vld [vmem:[#allocation8 + $0xc4] ss:$8 sps:$4 sm:$0xff]  }
 0x1b8   : > { %1267 = vst [vmem:[#allocation4 + $0xc0] sm:$0xff] %v2849_v40  ;;  %v2852_v42 = vld [vmem:[#allocation8 + $0xd0] ss:$8 sps:$4 sm:$0xff]   ;;  %v2854_v43 = vld [vmem:[#allocation8 + $0xd4] ss:$8 sps:$4 sm:$0xff]   ;;  %1268 = vst [vmem:[#allocation4 + $0xc8] sm:$0xff] %v2851_v41 }
 0x1b9   : > { %v2855_v44 = vld [vmem:[#allocation8 + $0xe0] ss:$8 sps:$4 sm:$0xff]   ;;  %v2857_v45 = vld [vmem:[#allocation8 + $0xe4] ss:$8 sps:$4 sm:$0xff]   ;;  %1269 = vst [vmem:[#allocation4 + $0xd0] sm:$0xff] %v2852_v42  ;;  %1270 = vst [vmem:[#allocation4 + $0xd8] sm:$0xff] %v2854_v43 }
 0x1ba   : > { %v2858_v46 = vld [vmem:[#allocation8 + $0xf0] ss:$8 sps:$4 sm:$0xff]   ;;  %1271 = vst [vmem:[#allocation4 + $0xe0] sm:$0xff] %v2855_v44  ;;  %1272 = vst [vmem:[#allocation4 + $0xe8] sm:$0xff] %v2857_v45  ;;  %v2860_v47 = vld [vmem:[#allocation8 + $0xf4] ss:$8 sps:$4 sm:$0xff]  }
 0x1bb   : > { %1273 = vst [vmem:[#allocation4 + $0xf0] sm:$0xff] %v2858_v46  ;;  %1274 = vst [vmem:[#allocation4 + $0xf8] sm:$0xff] %v2860_v47 }
 0x1bc PF: > { %p2390_p9 = scmp.le.s32.totalorder %s3029_s15, 0 }
 0x1bd   : > { %p1279_p10 = scmp.lt.s32.totalorder (!%p2390_p9), %s3029_s15, 0  ;;  %s1280_s21 = ssub.s32 (!%p2390_p9), 0, %s3029_s15  ;;  %v1323_v48 = vld [vmem:[#allocation4 + $0x8] sm:$0xff] (!%p2390_p9)  ;;  %v1322_v2 = vld [vmem:[#allocation4] sm:$0xff] (!%p2390_p9)  ;;  %v1325_v4 = vld [vmem:[#allocation4 + $0x18] sm:$0xff] (!%p2390_p9) }
 0x1be   : > { %1278 = sbr.rel (%p2390_p9) target bundleno = 769 (0x301), region = 72  ;;  %v1339_v49 = vld [vmem:[#allocation4 + $0x88] sm:$0xff] (!%p2390_p9)  ;;  %s2391_s9 = smin.u32 (!%p2390_p9), %s3029_s15, %s1280_s21  ;;  %1386 = vmatprep.mubr.bf16.mxu0 (!%p2390_p9), %v1323_v48  ;;  %v1338_v3 = vld [vmem:[#allocation4 + $0x80] sm:$0xff] (!%p2390_p9)  ;;  %v1341_v5 = vld [vmem:[#allocation4 + $0x98] sm:$0xff] (!%p2390_p9) }
 0x1bf   : > { %1450 = vmatprep.mubr.bf16.mxu1 (!%p2390_p9), %v1339_v49  ;;  %s1282_s10 = sand.u32 (!%p2390_p9), 1, %s2391_s9   ;;  %v1324_v6 = vld [vmem:[#allocation4 + $0x10] sm:$0xff] (!%p2390_p9)  ;;  %v1327_v8 = vld [vmem:[#allocation4 + $0x28] sm:$0xff] (!%p2390_p9)  ;;  %v1326_v10 = vld [vmem:[#allocation4 + $0x20] sm:$0xff] (!%p2390_p9) }
 0x1c0   : > { %s1283_s13 = ssub.s32 (!%p2390_p9), 0, %s1282_s10  ;;  %v1340_v7 = vld [vmem:[#allocation4 + $0x90] sm:$0xff] (!%p2390_p9)  ;;  %v1343_v9 = vld [vmem:[#allocation4 + $0xa8] sm:$0xff] (!%p2390_p9)  ;;  %v1342_v11 = vld [vmem:[#allocation4 + $0xa0] sm:$0xff] (!%p2390_p9) }
 0x1c1   : > { %v1329_v12 = vld [vmem:[#allocation4 + $0x38] sm:$0xff] (!%p2390_p9)  ;;  %v1328_v14 = vld [vmem:[#allocation4 + $0x30] sm:$0xff] (!%p2390_p9)  ;;  %v1331_v16 = vld [vmem:[#allocation4 + $0x48] sm:$0xff] (!%p2390_p9) }
 0x1c2   : > { %v1345_v13 = vld [vmem:[#allocation4 + $0xb8] sm:$0xff] (!%p2390_p9)  ;;  %v1344_v15 = vld [vmem:[#allocation4 + $0xb0] sm:$0xff] (!%p2390_p9)  ;;  %v1347_v17 = vld [vmem:[#allocation4 + $0xc8] sm:$0xff] (!%p2390_p9) }
 0x1c3   : > { %v1330_v18 = vld [vmem:[#allocation4 + $0x40] sm:$0xff] (!%p2390_p9)  ;;  %v1333_v20 = vld [vmem:[#allocation4 + $0x58] sm:$0xff] (!%p2390_p9)  ;;  %v1332_v22 = vld [vmem:[#allocation4 + $0x50] sm:$0xff] (!%p2390_p9) }
 0x1c4   : > { %v1346_v19 = vld [vmem:[#allocation4 + $0xc0] sm:$0xff] (!%p2390_p9)  ;;  %v1349_v21 = vld [vmem:[#allocation4 + $0xd8] sm:$0xff] (!%p2390_p9)  ;;  %v1348_v23 = vld [vmem:[#allocation4 + $0xd0] sm:$0xff] (!%p2390_p9) }
 0x1c5   : > { %s3425_s13 = smov (!%p1279_p10, %s1283_s13), %s1282_s10  ;;  %v1335_v24 = vld [vmem:[#allocation4 + $0x68] sm:$0xff]  ;;  %v1334_v26 = vld [vmem:[#allocation4 + $0x60] sm:$0xff]  ;;  %v1337_v28 = vld [vmem:[#allocation4 + $0x78] sm:$0xff] }
 0x1c6   : > { %p2393_p11 = scmp.lt.s32.totalorder %s3425_s13, 0  ;;  %s1289_s12 = sadd.s32 2, %s3425_s13  ;;  %v1351_v25 = vld [vmem:[#allocation4 + $0xe8] sm:$0xff]  ;;  %v1350_v27 = vld [vmem:[#allocation4 + $0xe0] sm:$0xff]  ;;  %v1353_v29 = vld [vmem:[#allocation4 + $0xf8] sm:$0xff] }
 0x1c7   : > { %v1336_v30 = vld [vmem:[#allocation4 + $0x70] sm:$0xff] }
 0x1c8   : > { %s3427_s12 = smov (!%p2393_p11, %s1289_s12), %s3425_s13  ;;  %v1352_v31 = vld [vmem:[#allocation4 + $0xf0] sm:$0xff] }
 0x1c9   : > { %s1291_s25 = ssub.s32 1, %s3427_s12 }
 0x1ca   : > { %s2394_s26 = sshll.u32 %s1291_s25, 8 }
 0x1cb   : > { %s1294_s27 = sshra.s32 %s2394_s26, 4 }
 0x1cc   : > { %s2395_s28 = sshll.u32 %s1294_s27, 3 }
 0x1cd   : > { %s3217_s29 = scalar_lea.vmem [#allocation2], %s2395_s28 }
 0x1ce   : > { %v1306_v50 = vld [vmem:[%s3217_s29 + $0x40] sm:$0xff]  ;;  %v1307_v52 = vld [vmem:[%s3217_s29 + $0x48] sm:$0xff]  ;;  %v1308_v54 = vld [vmem:[%s3217_s29 + $0x50] sm:$0xff] }
 0x1cf   : > { %v1298_v51 = vld [vmem:[%s3217_s29] sm:$0xff]  ;;  %2521 = vmatprep.subr.bf16.mxu0 %v1306_v50  ;;  %2649 = vmatprep.subr.bf16.mxu1 %v1306_v50  ;;  %v1299_v53 = vld [vmem:[%s3217_s29 + $0x8] sm:$0xff]  ;;  %v1300_v55 = vld [vmem:[%s3217_s29 + $0x10] sm:$0xff] }
 0x1d0   : > { %2522 = vmatpush3.bf16.msra.mxu0 %v1298_v51  ;;  %2657 = vmatpush3.bf16.msra.mxu1 %v1298_v51  ;;  %v1309_v56 = vld [vmem:[%s3217_s29 + $0x58] sm:$0xff]  ;;  %v1310_v58 = vld [vmem:[%s3217_s29 + $0x60] sm:$0xff]  ;;  %v1311_v60 = vld [vmem:[%s3217_s29 + $0x68] sm:$0xff] }
 0x1d1   : > { %2523 = vmatprep.subr.bf16.mxu0 %v1307_v52  ;;  %2650 = vmatprep.subr.bf16.mxu1 %v1307_v52  ;;  %v1301_v57 = vld [vmem:[%s3217_s29 + $0x18] sm:$0xff]  ;;  %v1302_v59 = vld [vmem:[%s3217_s29 + $0x20] sm:$0xff]  ;;  %v1303_v61 = vld [vmem:[%s3217_s29 + $0x28] sm:$0xff] }
 0x1d2   : > { %v1312_v62 = vld [vmem:[%s3217_s29 + $0x70] sm:$0xff]  ;;  %v1313_v0 = vld [vmem:[%s3217_s29 + $0x78] sm:$0xff] }
 0x1d3   : > { %v1304_v63 = vld [vmem:[%s3217_s29 + $0x30] sm:$0xff]  ;;  %v1305_v1 = vld [vmem:[%s3217_s29 + $0x38] sm:$0xff] }
 0x1d4   : > { %2524 = vmatpush3.bf16.msra.mxu0 %v1299_v53  ;;  %2658 = vmatpush3.bf16.msra.mxu1 %v1299_v53 }
 0x1d5   : > { %2525 = vmatprep.subr.bf16.mxu0 %v1308_v54  ;;  %2651 = vmatprep.subr.bf16.mxu1 %v1308_v54 }
 0x1d8   : > { %2526 = vmatpush3.bf16.msra.mxu0 %v1300_v55  ;;  %2659 = vmatpush3.bf16.msra.mxu1 %v1300_v55 }
 0x1d9   : > { %2527 = vmatprep.subr.bf16.mxu0 %v1309_v56  ;;  %2652 = vmatprep.subr.bf16.mxu1 %v1309_v56 }
 0x1dc   : > { %2528 = vmatpush3.bf16.msra.mxu0 %v1301_v57  ;;  %2660 = vmatpush3.bf16.msra.mxu1 %v1301_v57 }
 0x1dd   : > { %2529 = vmatprep.subr.bf16.mxu0 %v1310_v58  ;;  %2653 = vmatprep.subr.bf16.mxu1 %v1310_v58 }
 0x1e0   : > { %2530 = vmatpush3.bf16.msra.mxu0 %v1302_v59  ;;  %2661 = vmatpush3.bf16.msra.mxu1 %v1302_v59 }
 0x1e1   : > { %2531 = vmatprep.subr.bf16.mxu0 %v1311_v60  ;;  %2654 = vmatprep.subr.bf16.mxu1 %v1311_v60 }
 0x1e4   : > { %2532 = vmatpush3.bf16.msra.mxu0 %v1303_v61  ;;  %2662 = vmatpush3.bf16.msra.mxu1 %v1303_v61 }
 0x1e5   : > { %2533 = vmatprep.subr.bf16.mxu0 %v1312_v62  ;;  %2655 = vmatprep.subr.bf16.mxu1 %v1312_v62 }
 0x1e8   : > { %2534 = vmatpush3.bf16.msra.mxu0 %v1304_v63  ;;  %2663 = vmatpush3.bf16.msra.mxu1 %v1304_v63 }
 0x1e9   : > { %2535 = vmatprep.subr.bf16.mxu0 %v1313_v0  ;;  %2656 = vmatprep.subr.bf16.mxu1 %v1313_v0 }
 0x1ec   : > { %2536 = vmatpush3.bf16.msra.mxu0 %v1305_v1  ;;  %2664 = vmatpush3.bf16.msra.mxu1 %v1305_v1 }
 0x1ef   : > { %1387 = vmatmul.mubr.bf16.vlgmr.msra.gmra.mrb[0].mxu0 %v1322_v2  ;;  %1451 = vmatmul.mubr.bf16.vlgmr.msra.gmra.mrb[0].mxu1 %v1338_v3 }
 0x1f0   : > { %1394 = vmatprep.mubr.bf16.mxu0 %v1325_v4  ;;  %1458 = vmatprep.mubr.bf16.mxu1 %v1341_v5 }
 0x1f7   : > { %1395 = vmatmul.mubr.bf16.gmra.mrb[4].mxu0 %v1324_v6  ;;  %1459 = vmatmul.mubr.bf16.gmra.mrb[4].mxu1 %v1340_v7 }
 0x1f8   : > { %1402 = vmatprep.mubr.bf16.mxu0 %v1327_v8  ;;  %1466 = vmatprep.mubr.bf16.mxu1 %v1343_v9 }
 0x1ff   : > { %1403 = vmatmul.mubr.bf16.gmra.mrb[8].mxu0 %v1326_v10  ;;  %1467 = vmatmul.mubr.bf16.gmra.mrb[8].mxu1 %v1342_v11 }
 0x200   : > { %1410 = vmatprep.mubr.bf16.mxu0 %v1329_v12  ;;  %1474 = vmatprep.mubr.bf16.mxu1 %v1345_v13 }
 0x207   : > { %1411 = vmatmul.mubr.bf16.gmra.mrb[12].mxu0 %v1328_v14  ;;  %1475 = vmatmul.mubr.bf16.gmra.mrb[12].mxu1 %v1344_v15 }
 0x208   : > { %1418 = vmatprep.mubr.bf16.mxu0 %v1331_v16  ;;  %1482 = vmatprep.mubr.bf16.mxu1 %v1347_v17 }
 0x20f   : > { %1419 = vmatmul.mubr.bf16.gmra.mrb[16].mxu0 %v1330_v18  ;;  %1483 = vmatmul.mubr.bf16.gmra.mrb[16].mxu1 %v1346_v19 }
 0x210   : > { %1426 = vmatprep.mubr.bf16.mxu0 %v1333_v20  ;;  %1490 = vmatprep.mubr.bf16.mxu1 %v1349_v21 }
 0x217   : > { %1427 = vmatmul.mubr.bf16.gmra.mrb[20].mxu0 %v1332_v22  ;;  %1491 = vmatmul.mubr.bf16.gmra.mrb[20].mxu1 %v1348_v23 }
 0x218   : > { %1434 = vmatprep.mubr.bf16.mxu0 %v1335_v24  ;;  %1498 = vmatprep.mubr.bf16.mxu1 %v1351_v25 }
 0x21f   : > { %1435 = vmatmul.mubr.bf16.gmra.mrb[24].mxu0 %v1334_v26  ;;  %1499 = vmatmul.mubr.bf16.gmra.mrb[24].mxu1 %v1350_v27 }
 0x220   : > { %1442 = vmatprep.mubr.bf16.mxu0 %v1337_v28  ;;  %1506 = vmatprep.mubr.bf16.mxu1 %v1353_v29 }
 0x227   : > { %1443 = vmatmul.mubr.bf16.gmra.mrb[28].mxu0 %v1336_v30  ;;  %1507 = vmatmul.mubr.bf16.gmra.mrb[28].mxu1 %v1352_v31 }
 0x2c2   : > { %v2537_v32 = vpop.f32.mrb[0].mxu0  ;;  %v2585_v33 = vpop.f32.mrb[0].mxu1 }
 0x2c3   : > { %v2538_v34 = vpop.f32.mrb[1].mxu0  ;;  %v2586_v35 = vpop.f32.mrb[1].mxu1 }
 0x2c4   : > { %v2539_v36 = vadd.f32 %v2538_v34, %v2537_v32  ;;  %v2587_v37 = vadd.f32 %v2586_v35, %v2585_v33  ;;  %v2540_v38 = vpop.f32.mrb[2].mxu0  ;;  %v2588_v39 = vpop.f32.mrb[2].mxu1 }
 0x2c5   : > { %v2541_v40 = vpop.f32.mrb[3].mxu0  ;;  %v2589_v41 = vpop.f32.mrb[3].mxu1 }
 0x2c6   : > { %1519 = vst [vmem:[#allocation13] sm:$0xff] %v2539_v36  ;;  %1535 = vst [vmem:[#allocation13 + $0x80] sm:$0xff] %v2587_v37  ;;  %v2542_v42 = vadd.f32 %v2541_v40, %v2540_v38  ;;  %v2590_v43 = vadd.f32 %v2589_v41, %v2588_v39 }
 0x2c8   : > { %1520 = vst [vmem:[#allocation13 + $0x8] sm:$0xff] %v2542_v42  ;;  %1536 = vst [vmem:[#allocation13 + $0x88] sm:$0xff] %v2590_v43 }
 0x2ca   : > { %v2543_v44 = vpop.f32.mrb[4].mxu0  ;;  %v2591_v45 = vpop.f32.mrb[4].mxu1 }
 0x2cb   : > { %v2544_v46 = vpop.f32.mrb[5].mxu0  ;;  %v2592_v47 = vpop.f32.mrb[5].mxu1 }
 0x2cc   : > { %v2545_v48 = vadd.f32 %v2544_v46, %v2543_v44  ;;  %v2593_v49 = vadd.f32 %v2592_v47, %v2591_v45  ;;  %v2546_v50 = vpop.f32.mrb[6].mxu0  ;;  %v2594_v51 = vpop.f32.mrb[6].mxu1 }
 0x2cd   : > { %v2547_v52 = vpop.f32.mrb[7].mxu0  ;;  %v2595_v53 = vpop.f32.mrb[7].mxu1 }
 0x2ce   : > { %1521 = vst [vmem:[#allocation13 + $0x10] sm:$0xff] %v2545_v48  ;;  %1537 = vst [vmem:[#allocation13 + $0x90] sm:$0xff] %v2593_v49  ;;  %v2548_v54 = vadd.f32 %v2547_v52, %v2546_v50  ;;  %v2596_v55 = vadd.f32 %v2595_v53, %v2594_v51 }
 0x2d0   : > { %1522 = vst [vmem:[#allocation13 + $0x18] sm:$0xff] %v2548_v54  ;;  %1538 = vst [vmem:[#allocation13 + $0x98] sm:$0xff] %v2596_v55 }
 0x2d2   : > { %v2549_v56 = vpop.f32.mrb[8].mxu0  ;;  %v2597_v57 = vpop.f32.mrb[8].mxu1 }
 0x2d3   : > { %v2550_v58 = vpop.f32.mrb[9].mxu0  ;;  %v2598_v59 = vpop.f32.mrb[9].mxu1 }
 0x2d4   : > { %v2551_v60 = vadd.f32 %v2550_v58, %v2549_v56  ;;  %v2599_v61 = vadd.f32 %v2598_v59, %v2597_v57  ;;  %v2552_v62 = vpop.f32.mrb[10].mxu0  ;;  %v2600_v63 = vpop.f32.mrb[10].mxu1 }
 0x2d5   : > { %v2553_v0 = vpop.f32.mrb[11].mxu0  ;;  %v2601_v1 = vpop.f32.mrb[11].mxu1 }
 0x2d6   : > { %1523 = vst [vmem:[#allocation13 + $0x20] sm:$0xff] %v2551_v60  ;;  %1539 = vst [vmem:[#allocation13 + $0xa0] sm:$0xff] %v2599_v61  ;;  %v2554_v2 = vadd.f32 %v2553_v0, %v2552_v62  ;;  %v2602_v3 = vadd.f32 %v2601_v1, %v2600_v63 }
 0x2d8   : > { %1524 = vst [vmem:[#allocation13 + $0x28] sm:$0xff] %v2554_v2  ;;  %1540 = vst [vmem:[#allocation13 + $0xa8] sm:$0xff] %v2602_v3 }
 0x2da   : > { %v2555_v4 = vpop.f32.mrb[12].mxu0  ;;  %v2603_v5 = vpop.f32.mrb[12].mxu1 }
 0x2db   : > { %v2556_v6 = vpop.f32.mrb[13].mxu0  ;;  %v2604_v7 = vpop.f32.mrb[13].mxu1 }
 0x2dc   : > { %v2557_v8 = vadd.f32 %v2556_v6, %v2555_v4  ;;  %v2605_v9 = vadd.f32 %v2604_v7, %v2603_v5  ;;  %v2558_v10 = vpop.f32.mrb[14].mxu0  ;;  %v2606_v11 = vpop.f32.mrb[14].mxu1 }
 0x2dd   : > { %v2559_v12 = vpop.f32.mrb[15].mxu0  ;;  %v2607_v13 = vpop.f32.mrb[15].mxu1 }
 0x2de   : > { %1525 = vst [vmem:[#allocation13 + $0x30] sm:$0xff] %v2557_v8  ;;  %1541 = vst [vmem:[#allocation13 + $0xb0] sm:$0xff] %v2605_v9  ;;  %v2560_v14 = vadd.f32 %v2559_v12, %v2558_v10  ;;  %v2608_v15 = vadd.f32 %v2607_v13, %v2606_v11 }
 0x2e0   : > { %1526 = vst [vmem:[#allocation13 + $0x38] sm:$0xff] %v2560_v14  ;;  %1542 = vst [vmem:[#allocation13 + $0xb8] sm:$0xff] %v2608_v15 }
 0x2e2   : > { %v2561_v16 = vpop.f32.mrb[16].mxu0  ;;  %v2609_v17 = vpop.f32.mrb[16].mxu1 }
 0x2e3   : > { %v2562_v18 = vpop.f32.mrb[17].mxu0  ;;  %v2610_v19 = vpop.f32.mrb[17].mxu1 }
 0x2e4   : > { %v2563_v20 = vadd.f32 %v2562_v18, %v2561_v16  ;;  %v2611_v21 = vadd.f32 %v2610_v19, %v2609_v17  ;;  %v2564_v22 = vpop.f32.mrb[18].mxu0  ;;  %v2612_v23 = vpop.f32.mrb[18].mxu1 }
 0x2e5   : > { %v2565_v24 = vpop.f32.mrb[19].mxu0  ;;  %v2613_v25 = vpop.f32.mrb[19].mxu1 }
 0x2e6   : > { %1527 = vst [vmem:[#allocation13 + $0x40] sm:$0xff] %v2563_v20  ;;  %1543 = vst [vmem:[#allocation13 + $0xc0] sm:$0xff] %v2611_v21  ;;  %v2566_v26 = vadd.f32 %v2565_v24, %v2564_v22  ;;  %v2614_v27 = vadd.f32 %v2613_v25, %v2612_v23 }
 0x2e8   : > { %1528 = vst [vmem:[#allocation13 + $0x48] sm:$0xff] %v2566_v26  ;;  %1544 = vst [vmem:[#allocation13 + $0xc8] sm:$0xff] %v2614_v27 }
 0x2ea   : > { %v2567_v28 = vpop.f32.mrb[20].mxu0  ;;  %v2615_v29 = vpop.f32.mrb[20].mxu1 }
 0x2eb   : > { %v2568_v30 = vpop.f32.mrb[21].mxu0  ;;  %v2616_v31 = vpop.f32.mrb[21].mxu1 }
 0x2ec   : > { %v2569_v32 = vadd.f32 %v2568_v30, %v2567_v28  ;;  %v2617_v33 = vadd.f32 %v2616_v31, %v2615_v29  ;;  %v2570_v34 = vpop.f32.mrb[22].mxu0  ;;  %v2618_v35 = vpop.f32.mrb[22].mxu1 }
 0x2ed   : > { %v2571_v36 = vpop.f32.mrb[23].mxu0  ;;  %v2619_v37 = vpop.f32.mrb[23].mxu1 }
 0x2ee   : > { %1529 = vst [vmem:[#allocation13 + $0x50] sm:$0xff] %v2569_v32  ;;  %1545 = vst [vmem:[#allocation13 + $0xd0] sm:$0xff] %v2617_v33  ;;  %v2572_v38 = vadd.f32 %v2571_v36, %v2570_v34  ;;  %v2620_v39 = vadd.f32 %v2619_v37, %v2618_v35 }
 0x2f0   : > { %1530 = vst [vmem:[#allocation13 + $0x58] sm:$0xff] %v2572_v38  ;;  %1546 = vst [vmem:[#allocation13 + $0xd8] sm:$0xff] %v2620_v39 }
 0x2f2   : > { %v2573_v40 = vpop.f32.mrb[24].mxu0  ;;  %v2621_v41 = vpop.f32.mrb[24].mxu1 }
 0x2f3   : > { %v2574_v42 = vpop.f32.mrb[25].mxu0  ;;  %v2622_v43 = vpop.f32.mrb[25].mxu1 }
 0x2f4   : > { %v2575_v44 = vadd.f32 %v2574_v42, %v2573_v40  ;;  %v2623_v45 = vadd.f32 %v2622_v43, %v2621_v41  ;;  %v2576_v46 = vpop.f32.mrb[26].mxu0  ;;  %v2624_v47 = vpop.f32.mrb[26].mxu1 }
 0x2f5   : > { %v2577_v48 = vpop.f32.mrb[27].mxu0  ;;  %v2625_v49 = vpop.f32.mrb[27].mxu1 }
 0x2f6   : > { %1531 = vst [vmem:[#allocation13 + $0x60] sm:$0xff] %v2575_v44  ;;  %1547 = vst [vmem:[#allocation13 + $0xe0] sm:$0xff] %v2623_v45  ;;  %v2578_v50 = vadd.f32 %v2577_v48, %v2576_v46  ;;  %v2626_v51 = vadd.f32 %v2625_v49, %v2624_v47 }
 0x2f8   : > { %1532 = vst [vmem:[#allocation13 + $0x68] sm:$0xff] %v2578_v50  ;;  %1548 = vst [vmem:[#allocation13 + $0xe8] sm:$0xff] %v2626_v51 }
 0x2fa   : > { %v2579_v52 = vpop.f32.mrb[28].mxu0  ;;  %v2627_v53 = vpop.f32.mrb[28].mxu1 }
 0x2fb   : > { %v2580_v54 = vpop.f32.mrb[29].mxu0  ;;  %v2628_v55 = vpop.f32.mrb[29].mxu1 }
 0x2fc   : > { %v2581_v56 = vadd.f32 %v2580_v54, %v2579_v52  ;;  %v2629_v57 = vadd.f32 %v2628_v55, %v2627_v53  ;;  %v2582_v58 = vpop.f32.mrb[30].mxu0  ;;  %v2630_v59 = vpop.f32.mrb[30].mxu1 }
 0x2fd   : > { %v2583_v60 = vpop.f32.mrb[31].mxu0  ;;  %v2631_v61 = vpop.f32.mrb[31].mxu1 }
 0x2fe   : > { %1533 = vst [vmem:[#allocation13 + $0x70] sm:$0xff] %v2581_v56  ;;  %1549 = vst [vmem:[#allocation13 + $0xf0] sm:$0xff] %v2629_v57  ;;  %v2584_v62 = vadd.f32 %v2583_v60, %v2582_v58  ;;  %v2632_v63 = vadd.f32 %v2631_v61, %v2630_v59 }
 0x300   : > { %1534 = vst [vmem:[#allocation13 + $0x78] sm:$0xff] %v2584_v62  ;;  %1550 = vst [vmem:[#allocation13 + $0xf8] sm:$0xff] %v2632_v63 }
 0x301 PF: > { %p1655_p12 = scmp.lt.s32.totalorder %s3029_s15, 0  ;;  %s1656_s23 = ssub.s32 0, %s3029_s15  ;;  %v1672_v0 = vld [vmem:[#allocation13] sm:$0xff] (!%p2308_p8)  ;;  %v1673_v2 = vld [vmem:[#allocation13 + $0x8] sm:$0xff] (!%p2308_p8)  ;;  %v1674_v5 = vld [vmem:[#allocation13 + $0x10] sm:$0xff] (!%p2308_p8) }
 0x302   : > { %s2396_s5 = smin.u32 %s3029_s15, %s1656_s23  ;;  %v1704_v1 = vld [vmem:[#allocation11] sm:$0xff] (!%p2308_p8)  ;;  %v1705_v4 = vld [vmem:[#allocation11 + $0x8] sm:$0xff] (!%p2308_p8)  ;;  %v1706_v6 = vld [vmem:[#allocation11 + $0x10] sm:$0xff] (!%p2308_p8) }
 0x303   : > { %s1658_s22 = sand.u32 1, %s2396_s5   ;;  %1671 = sbr.rel (%p2308_p8) target bundleno = 821 (0x335), region = 88  ;;  %v1736_v3 = vmul.f32 (!%p2308_p8), 0.95238096, %v1704_v1  ;;  %v1737_v7 = vmul.f32 (!%p2308_p8), 0.95238096, %v1705_v4 }
 0x304   : > { %s1659_s6 = ssub.s32 0, %s1658_s22  ;;  %v1738_v8 = vmul.f32 (!%p2308_p8), 0.95238096, %v1706_v6  ;;  %v1675_v9 = vld [vmem:[#allocation13 + $0x18] sm:$0xff] (!%p2308_p8)  ;;  %v1676_v13 = vld [vmem:[#allocation13 + $0x20] sm:$0xff] (!%p2308_p8)  ;;  %v1677_v15 = vld [vmem:[#allocation13 + $0x28] sm:$0xff] (!%p2308_p8) }
 0x305   : > { %s3429_s6 = smov (!%p1655_p12, %s1659_s6), %s1658_s22  ;;  %v1707_v10 = vld [vmem:[#allocation11 + $0x18] sm:$0xff] (!%p2308_p8)  ;;  %v1768_v11 = vadd.f32 (!%p2308_p8), %v1736_v3, %v1672_v0  ;;  %v1708_v14 = vld [vmem:[#allocation11 + $0x20] sm:$0xff] (!%p2308_p8)  ;;  %v1769_v16 = vadd.f32 (!%p2308_p8), %v1737_v7, %v1673_v2  ;;  %v1709_v19 = vld [vmem:[#allocation11 + $0x28] sm:$0xff] (!%p2308_p8) }
 0x306   : > { %p2398_p13 = scmp.lt.s32.totalorder %s3429_s6, 0  ;;  %s1665_s24 = sadd.s32 2, %s3429_s6  ;;  %v1739_v12 = vmul.f32 (!%p2308_p8), 0.95238096, %v1707_v10  ;;  %v1770_v17 = vadd.f32 (!%p2308_p8), %v1738_v8, %v1674_v5  ;;  %v1740_v18 = vmul.f32 (!%p2308_p8), 0.95238096, %v1708_v14 }
 0x307   : > { %v1678_v20 = vld [vmem:[#allocation13 + $0x30] sm:$0xff] (!%p2308_p8)  ;;  %v1800_v22 = vmul.f32 (!%p2308_p8), 0.1, %v1768_v11  ;;  %1901 = vst [vmem:[#allocation13] sm:$0xff] (!%p2308_p8), %v1768_v11  ;;  %v1741_v24 = vmul.f32 (!%p2308_p8), 0.95238096, %v1709_v19  ;;  %v1865_v31 = vpack.c.bf16 (!%p2308_p8), %v1769_v16, %v1768_v11 }
 0x308   : > { %s3431_s24 = smov (!%p2398_p13, %s1665_s24), %s3429_s6  ;;  %v1710_v21 = vld [vmem:[#allocation11 + $0x30] sm:$0xff] (!%p2308_p8)  ;;  %v1771_v23 = vadd.f32 (!%p2308_p8), %v1739_v12, %v1675_v9  ;;  %v1801_v26 = vmul.f32 (!%p2308_p8), 0.1, %v1769_v16  ;;  %1902 = vst [vmem:[#allocation13 + $0x8] sm:$0xff] (!%p2308_p8), %v1769_v16  ;;  %v1802_v27 = vmul.f32 (!%p2308_p8), 0.1, %v1770_v17  ;;  %v1772_v28 = vadd.f32 (!%p2308_p8), %v1740_v18, %v1676_v13 }
 0x309   : > { %s2399_s20 = sshll.u32 %s3431_s24, 8  ;;  %v1742_v25 = vmul.f32 (!%p2308_p8), 0.95238096, %v1710_v21  ;;  %1903 = vst [vmem:[#allocation13 + $0x10] sm:$0xff] (!%p2308_p8), %v1770_v17  ;;  %v1679_v29 = vld [vmem:[#allocation13 + $0x38] sm:$0xff] (!%p2308_p8)  ;;  %1833 = vst [vmem:[#allocation3] sm:$0xff] (!%p2308_p8), %v1800_v22  ;;  %v1773_v33 = vadd.f32 (!%p2308_p8), %v1741_v24, %v1677_v15 }
 0x30a   : > { %s3245_s7 = sshra.s32 %s2399_s20, 4  ;;  %v1711_v30 = vld [vmem:[#allocation11 + $0x38] sm:$0xff]  ;;  %v1803_v32 = vmul.f32 0.1, %v1771_v23  ;;  %1904 = vst [vmem:[#allocation13 + $0x18] sm:$0xff] %v1771_v23  ;;  %v1680_v36 = vld [vmem:[#allocation13 + $0x40] sm:$0xff]  ;;  %v1866_v42 = vpack.c.bf16 %v1771_v23, %v1770_v17 }
 0x30b   : > { %s2401_s8 = sshll.u32 %s3245_s7, 3  ;;  %v1774_v34 = vadd.f32 %v1742_v25, %v1678_v20  ;;  %v1743_v35 = vmul.f32 0.95238096, %v1711_v30  ;;  %v1712_v37 = vld [vmem:[#allocation11 + $0x40] sm:$0xff]  ;;  %1834 = vst [vmem:[#allocation3 + $0x8] sm:$0xff] %v1801_v26  ;;  %1835 = vst [vmem:[#allocation3 + $0x10] sm:$0xff] %v1802_v27  ;;  %v1867_v51 = vpack.c.bf16 %v1773_v33, %v1772_v28 }
 0x30c   : > { %v1804_v38 = vmul.f32 0.1, %v1772_v28  ;;  %1905 = vst [vmem:[#allocation13 + $0x20] sm:$0xff] %v1772_v28  ;;  %v1744_v39 = vmul.f32 0.95238096, %v1712_v37  ;;  %v1681_v40 = vld [vmem:[#allocation13 + $0x48] sm:$0xff] }
 0x30d   : > { %v1713_v41 = vld [vmem:[#allocation11 + $0x48] sm:$0xff]  ;;  %s3250_s30 = scalar_lea.vmem [#allocation2], %s2401_s8  ;;  %1836 = vst [vmem:[#allocation3 + $0x18] sm:$0xff] %v1803_v32  ;;  %v1805_v43 = vmul.f32 0.1, %v1773_v33  ;;  %1906 = vst [vmem:[#allocation13 + $0x28] sm:$0xff] %v1773_v33  ;;  %v1775_v45 = vadd.f32 %v1743_v35, %v1679_v29 }
 0x30e   : > { %1885 = vst [vmem:[%s3250_s30] sm:$0xff] %v1865_v31  ;;  %v1806_v44 = vmul.f32 0.1, %v1774_v34  ;;  %1907 = vst [vmem:[#allocation13 + $0x30] sm:$0xff] %v1774_v34  ;;  %v1745_v46 = vmul.f32 0.95238096, %v1713_v41  ;;  %v1776_v47 = vadd.f32 %v1744_v39, %v1680_v36  ;;  %v1682_v48 = vld [vmem:[#allocation13 + $0x50] sm:$0xff] }
 0x30f   : > { %1837 = vst [vmem:[#allocation3 + $0x20] sm:$0xff] %v1804_v38  ;;  %v1714_v49 = vld [vmem:[#allocation11 + $0x50] sm:$0xff]  ;;  %v1683_v50 = vld [vmem:[#allocation13 + $0x58] sm:$0xff]  ;;  %1886 = vst [vmem:[%s3250_s30 + $0x8] sm:$0xff] %v1866_v42  ;;  %v1807_v52 = vmul.f32 0.1, %v1775_v45  ;;  %v1868_v57 = vpack.c.bf16 %v1775_v45, %v1774_v34 }
 0x310   : > { %1838 = vst [vmem:[#allocation3 + $0x28] sm:$0xff] %v1805_v43  ;;  %1839 = vst [vmem:[#allocation3 + $0x30] sm:$0xff] %v1806_v44  ;;  %v1777_v53 = vadd.f32 %v1745_v46, %v1681_v40  ;;  %v1746_v54 = vmul.f32 0.95238096, %v1714_v49  ;;  %v1715_v55 = vld [vmem:[#allocation11 + $0x58] sm:$0xff]  ;;  %v1684_v56 = vld [vmem:[#allocation13 + $0x60] sm:$0xff] }
 0x311   : > { %1908 = vst [vmem:[#allocation13 + $0x38] sm:$0xff] %v1775_v45  ;;  %v1808_v58 = vmul.f32 0.1, %v1776_v47  ;;  %1909 = vst [vmem:[#allocation13 + $0x40] sm:$0xff] %v1776_v47  ;;  %v1747_v59 = vmul.f32 0.95238096, %v1715_v55 }
 0x312   : > { %v1716_v60 = vld [vmem:[#allocation11 + $0x60] sm:$0xff]  ;;  %v1685_v61 = vld [vmem:[#allocation13 + $0x68] sm:$0xff]  ;;  %1887 = vst [vmem:[%s3250_s30 + $0x10] sm:$0xff] %v1867_v51  ;;  %1840 = vst [vmem:[#allocation3 + $0x38] sm:$0xff] %v1807_v52  ;;  %v1809_v62 = vmul.f32 0.1, %v1777_v53  ;;  %v1778_v63 = vadd.f32 %v1746_v54, %v1682_v48  ;;  %v1869_v3 = vpack.c.bf16 %v1777_v53, %v1776_v47 }
 0x313   : > { %1910 = vst [vmem:[#allocation13 + $0x48] sm:$0xff] %v1777_v53  ;;  %v1748_v0 = vmul.f32 0.95238096, %v1716_v60  ;;  %v1717_v1 = vld [vmem:[#allocation11 + $0x68] sm:$0xff]  ;;  %v1686_v2 = vld [vmem:[#allocation13 + $0x70] sm:$0xff]  ;;  %1888 = vst [vmem:[%s3250_s30 + $0x18] sm:$0xff] %v1868_v57  ;;  %v1779_v4 = vadd.f32 %v1747_v59, %v1683_v50 }
 0x314   : > { %1841 = vst [vmem:[#allocation3 + $0x40] sm:$0xff] %v1808_v58  ;;  %v1749_v5 = vmul.f32 0.95238096, %v1717_v1  ;;  %v1718_v6 = vld [vmem:[#allocation11 + $0x70] sm:$0xff]  ;;  %v1687_v7 = vld [vmem:[#allocation13 + $0x78] sm:$0xff]  ;;  %1842 = vst [vmem:[#allocation3 + $0x48] sm:$0xff] %v1809_v62 }
 0x315   : > { %v1719_v8 = vld [vmem:[#allocation11 + $0x78] sm:$0xff]  ;;  %v1810_v9 = vmul.f32 0.1, %v1778_v63  ;;  %1911 = vst [vmem:[#allocation13 + $0x50] sm:$0xff] %v1778_v63  ;;  %v1780_v10 = vadd.f32 %v1748_v0, %v1684_v56  ;;  %v1750_v11 = vmul.f32 0.95238096, %v1718_v6  ;;  %v1870_v18 = vpack.c.bf16 %v1779_v4, %v1778_v63 }
 0x316   : > { %v1751_v12 = vmul.f32 0.95238096, %v1719_v8  ;;  %1889 = vst [vmem:[%s3250_s30 + $0x20] sm:$0xff] %v1869_v3  ;;  %v1811_v13 = vmul.f32 0.1, %v1779_v4  ;;  %1912 = vst [vmem:[#allocation13 + $0x58] sm:$0xff] %v1779_v4  ;;  %v1781_v14 = vadd.f32 %v1749_v5, %v1685_v61 }
 0x317   : > { %v1688_v15 = vld [vmem:[#allocation13 + $0x80] sm:$0xff]  ;;  %v1689_v17 = vld [vmem:[#allocation13 + $0x88] sm:$0xff]  ;;  %1843 = vst [vmem:[#allocation3 + $0x50] sm:$0xff] %v1810_v9  ;;  %v1812_v19 = vmul.f32 0.1, %v1780_v10  ;;  %1913 = vst [vmem:[#allocation13 + $0x60] sm:$0xff] %v1780_v10  ;;  %v1782_v20 = vadd.f32 %v1750_v11, %v1686_v2 }
 0x318   : > { %v1720_v16 = vld [vmem:[#allocation11 + $0x80] sm:$0xff]  ;;  %v1783_v21 = vadd.f32 %v1751_v12, %v1687_v7  ;;  %v1721_v23 = vld [vmem:[#allocation11 + $0x88] sm:$0xff]  ;;  %v1690_v24 = vld [vmem:[#allocation13 + $0x90] sm:$0xff]  ;;  %1844 = vst [vmem:[#allocation3 + $0x58] sm:$0xff] %v1811_v13  ;;  %v1813_v25 = vmul.f32 0.1, %v1781_v14  ;;  %v1871_v29 = vpack.c.bf16 %v1781_v14, %v1780_v10 }
 0x319   : > { %v1752_v22 = vmul.f32 0.95238096, %v1720_v16  ;;  %1914 = vst [vmem:[#allocation13 + $0x68] sm:$0xff] %v1781_v14  ;;  %v1753_v26 = vmul.f32 0.95238096, %v1721_v23  ;;  %v1722_v27 = vld [vmem:[#allocation11 + $0x90] sm:$0xff] }
 0x31a   : > { %v1691_v28 = vld [vmem:[#allocation13 + $0x98] sm:$0xff]  ;;  %1890 = vst [vmem:[%s3250_s30 + $0x28] sm:$0xff] %v1870_v18  ;;  %1845 = vst [vmem:[#allocation3 + $0x60] sm:$0xff] %v1812_v19  ;;  %v1814_v30 = vmul.f32 0.1, %v1782_v20  ;;  %v1692_v36 = vld [vmem:[#allocation13 + $0xa0] sm:$0xff]  ;;  %v1872_v38 = vpack.c.bf16 %v1783_v21, %v1782_v20 }
 0x31b   : > { %1915 = vst [vmem:[#allocation13 + $0x70] sm:$0xff] %v1782_v20  ;;  %v1815_v31 = vmul.f32 0.1, %v1783_v21  ;;  %1916 = vst [vmem:[#allocation13 + $0x78] sm:$0xff] %v1783_v21  ;;  %v1784_v32 = vadd.f32 %v1752_v22, %v1688_v15  ;;  %v1754_v33 = vmul.f32 0.95238096, %v1722_v27  ;;  %v1785_v34 = vadd.f32 %v1753_v26, %v1689_v17 }
 0x31c   : > { %1846 = vst [vmem:[#allocation3 + $0x68] sm:$0xff] %v1813_v25  ;;  %v1723_v35 = vld [vmem:[#allocation11 + $0x98] sm:$0xff]  ;;  %v1724_v37 = vld [vmem:[#allocation11 + $0xa0] sm:$0xff]  ;;  %1891 = vst [vmem:[%s3250_s30 + $0x30] sm:$0xff] %v1871_v29 }
 0x31d   : > { %1847 = vst [vmem:[#allocation3 + $0x70] sm:$0xff] %v1814_v30  ;;  %1848 = vst [vmem:[#allocation3 + $0x78] sm:$0xff] %v1815_v31  ;;  %v1816_v39 = vmul.f32 0.1, %v1784_v32  ;;  %v1786_v40 = vadd.f32 %v1754_v33, %v1690_v24  ;;  %v1755_v41 = vmul.f32 0.95238096, %v1723_v35  ;;  %v1873_v47 = vpack.c.bf16 %v1785_v34, %v1784_v32 }
 0x31e   : > { %1917 = vst [vmem:[#allocation13 + $0x80] sm:$0xff] %v1784_v32  ;;  %v1756_v42 = vmul.f32 0.95238096, %v1724_v37  ;;  %v1817_v43 = vmul.f32 0.1, %v1785_v34  ;;  %1918 = vst [vmem:[#allocation13 + $0x88] sm:$0xff] %v1785_v34 }
 0x31f   : > { %v1693_v44 = vld [vmem:[#allocation13 + $0xa8] sm:$0xff]  ;;  %v1694_v46 = vld [vmem:[#allocation13 + $0xb0] sm:$0xff]  ;;  %1892 = vst [vmem:[%s3250_s30 + $0x38] sm:$0xff] %v1872_v38  ;;  %1849 = vst [vmem:[#allocation3 + $0x80] sm:$0xff] %v1816_v39  ;;  %v1818_v48 = vmul.f32 0.1, %v1786_v40  ;;  %v1787_v49 = vadd.f32 %v1755_v41, %v1691_v28 }
 0x320   : > { %v1725_v45 = vld [vmem:[#allocation11 + $0xa8] sm:$0xff]  ;;  %1919 = vst [vmem:[#allocation13 + $0x90] sm:$0xff] %v1786_v40  ;;  %v1788_v50 = vadd.f32 %v1756_v42, %v1692_v36  ;;  %v1726_v52 = vld [vmem:[#allocation11 + $0xb0] sm:$0xff]  ;;  %v1695_v53 = vld [vmem:[#allocation13 + $0xb8] sm:$0xff] }
 0x321   : > { %v1757_v51 = vmul.f32 0.95238096, %v1725_v45  ;;  %1850 = vst [vmem:[#allocation3 + $0x88] sm:$0xff] %v1817_v43  ;;  %v1758_v54 = vmul.f32 0.95238096, %v1726_v52  ;;  %v1727_v55 = vld [vmem:[#allocation11 + $0xb8] sm:$0xff]  ;;  %v1874_v2 = vpack.c.bf16 %v1787_v49, %v1786_v40 }
 0x322   : > { %v1696_v56 = vld [vmem:[#allocation13 + $0xc0] sm:$0xff]  ;;  %1893 = vst [vmem:[%s3250_s30 + $0x40] sm:$0xff] %v1873_v47  ;;  %1851 = vst [vmem:[#allocation3 + $0x90] sm:$0xff] %v1818_v48  ;;  %v1819_v58 = vmul.f32 0.1, %v1787_v49  ;;  %v1697_v0 = vld [vmem:[#allocation13 + $0xc8] sm:$0xff] }
 0x323   : > { %v1728_v57 = vld [vmem:[#allocation11 + $0xc0] sm:$0xff]  ;;  %1920 = vst [vmem:[#allocation13 + $0x98] sm:$0xff] %v1787_v49  ;;  %v1820_v59 = vmul.f32 0.1, %v1788_v50  ;;  %1921 = vst [vmem:[#allocation13 + $0xa0] sm:$0xff] %v1788_v50  ;;  %v1789_v60 = vadd.f32 %v1757_v51, %v1693_v44  ;;  %v1790_v62 = vadd.f32 %v1758_v54, %v1694_v46  ;;  %v1729_v1 = vld [vmem:[#allocation11 + $0xc8] sm:$0xff] }
 0x324   : > { %v1759_v61 = vmul.f32 0.95238096, %v1727_v55  ;;  %v1760_v63 = vmul.f32 0.95238096, %v1728_v57  ;;  %1852 = vst [vmem:[#allocation3 + $0x98] sm:$0xff] %v1819_v58  ;;  %v1698_v6 = vld [vmem:[#allocation13 + $0xd0] sm:$0xff] }
 0x325   : > { %1853 = vst [vmem:[#allocation3 + $0xa0] sm:$0xff] %v1820_v59  ;;  %v1821_v3 = vmul.f32 0.1, %v1789_v60  ;;  %1922 = vst [vmem:[#allocation13 + $0xa8] sm:$0xff] %v1789_v60  ;;  %v1761_v5 = vmul.f32 0.95238096, %v1729_v1  ;;  %v1875_v8 = vpack.c.bf16 %v1789_v60, %v1788_v50 }
 0x326   : > { %v1791_v4 = vadd.f32 %v1759_v61, %v1695_v53  ;;  %v1730_v7 = vld [vmem:[#allocation11 + $0xd0] sm:$0xff]  ;;  %v1822_v9 = vmul.f32 0.1, %v1790_v62  ;;  %1923 = vst [vmem:[#allocation13 + $0xb0] sm:$0xff] %v1790_v62  ;;  %v1792_v10 = vadd.f32 %v1760_v63, %v1696_v56  ;;  %v1699_v12 = vld [vmem:[#allocation13 + $0xd8] sm:$0xff]  ;;  %1894 = vst [vmem:[%s3250_s30 + $0x48] sm:$0xff] %v1874_v2 }
 0x327   : > { %v1762_v11 = vmul.f32 0.95238096, %v1730_v7  ;;  %v1731_v13 = vld [vmem:[#allocation11 + $0xd8] sm:$0xff]  ;;  %1854 = vst [vmem:[#allocation3 + $0xa8] sm:$0xff] %v1821_v3  ;;  %v1793_v15 = vadd.f32 %v1761_v5, %v1697_v0  ;;  %v1700_v17 = vld [vmem:[#allocation13 + $0xe0] sm:$0xff]  ;;  %1895 = vst [vmem:[%s3250_s30 + $0x50] sm:$0xff] %v1875_v8 }
 0x328   : > { %v1823_v14 = vmul.f32 0.1, %v1791_v4  ;;  %1924 = vst [vmem:[#allocation13 + $0xb8] sm:$0xff] %v1791_v4  ;;  %v1763_v16 = vmul.f32 0.95238096, %v1731_v13  ;;  %v1732_v18 = vld [vmem:[#allocation11 + $0xe0] sm:$0xff]  ;;  %v1876_v19 = vpack.c.bf16 %v1791_v4, %v1790_v62 }
 0x329   : > { %1855 = vst [vmem:[#allocation3 + $0xb0] sm:$0xff] %v1822_v9  ;;  %v1824_v20 = vmul.f32 0.1, %v1792_v10  ;;  %1925 = vst [vmem:[#allocation13 + $0xc0] sm:$0xff] %v1792_v10  ;;  %v1794_v21 = vadd.f32 %v1762_v11, %v1698_v6  ;;  %v1764_v22 = vmul.f32 0.95238096, %v1732_v18  ;;  %v1877_v30 = vpack.c.bf16 %v1793_v15, %v1792_v10 }
 0x32a   : > { %v1701_v23 = vld [vmem:[#allocation13 + $0xe8] sm:$0xff]  ;;  %1856 = vst [vmem:[#allocation3 + $0xb8] sm:$0xff] %v1823_v14  ;;  %v1825_v25 = vmul.f32 0.1, %v1793_v15  ;;  %1926 = vst [vmem:[#allocation13 + $0xc8] sm:$0xff] %v1793_v15  ;;  %v1795_v26 = vadd.f32 %v1763_v16, %v1699_v12  ;;  %v1702_v28 = vld [vmem:[#allocation13 + $0xf0] sm:$0xff] }
 0x32b   : > { %v1733_v24 = vld [vmem:[#allocation11 + $0xe8] sm:$0xff]  ;;  %v1734_v29 = vld [vmem:[#allocation11 + $0xf0] sm:$0xff]  ;;  %1896 = vst [vmem:[%s3250_s30 + $0x58] sm:$0xff] %v1876_v19  ;;  %1857 = vst [vmem:[#allocation3 + $0xc0] sm:$0xff] %v1824_v20  ;;  %v1826_v31 = vmul.f32 0.1, %v1794_v21  ;;  %v1796_v32 = vadd.f32 %v1764_v22, %v1700_v17 }
 0x32c   : > { %v1765_v27 = vmul.f32 0.95238096, %v1733_v24  ;;  %1927 = vst [vmem:[#allocation13 + $0xd0] sm:$0xff] %v1794_v21  ;;  %v1766_v33 = vmul.f32 0.95238096, %v1734_v29  ;;  %v1703_v34 = vld [vmem:[#allocation13 + $0xf8] sm:$0xff]  ;;  %v1878_v39 = vpack.c.bf16 %v1795_v26, %v1794_v21 }
 0x32d   : > { %v1735_v35 = vld [vmem:[#allocation11 + $0xf8] sm:$0xff]  ;;  %1858 = vst [vmem:[#allocation3 + $0xc8] sm:$0xff] %v1825_v25  ;;  %v1827_v36 = vmul.f32 0.1, %v1795_v26  ;;  %1928 = vst [vmem:[#allocation13 + $0xd8] sm:$0xff] %v1795_v26 }
 0x32e   : > { %v1797_v37 = vadd.f32 %v1765_v27, %v1701_v23  ;;  %v1767_v38 = vmul.f32 0.95238096, %v1735_v35  ;;  %1897 = vst [vmem:[%s3250_s30 + $0x60] sm:$0xff] %v1877_v30  ;;  %1859 = vst [vmem:[#allocation3 + $0xd0] sm:$0xff] %v1826_v31  ;;  %v1828_v40 = vmul.f32 0.1, %v1796_v32  ;;  %v1798_v41 = vadd.f32 %v1766_v33, %v1702_v28 }
 0x32f   : > { %1929 = vst [vmem:[#allocation13 + $0xe0] sm:$0xff] %v1796_v32  ;;  %1860 = vst [vmem:[#allocation3 + $0xd8] sm:$0xff] %v1827_v36 }
 0x330   : > { %v1829_v42 = vmul.f32 0.1, %v1797_v37  ;;  %1930 = vst [vmem:[#allocation13 + $0xe8] sm:$0xff] %v1797_v37  ;;  %v1799_v43 = vadd.f32 %v1767_v38, %v1703_v34  ;;  %1898 = vst [vmem:[%s3250_s30 + $0x68] sm:$0xff] %v1878_v39  ;;  %v1879_v44 = vpack.c.bf16 %v1797_v37, %v1796_v32  ;;  %v1830_v45 = vmul.f32 0.1, %v1798_v41 }
 0x331   : > { %1861 = vst [vmem:[#allocation3 + $0xe0] sm:$0xff] %v1828_v40  ;;  %1931 = vst [vmem:[#allocation13 + $0xf0] sm:$0xff] %v1798_v41 }
 0x332   : > { %1862 = vst [vmem:[#allocation3 + $0xe8] sm:$0xff] %v1829_v42  ;;  %v1831_v46 = vmul.f32 0.1, %v1799_v43  ;;  %1932 = vst [vmem:[#allocation13 + $0xf8] sm:$0xff] %v1799_v43  ;;  %v1880_v47 = vpack.c.bf16 %v1799_v43, %v1798_v41 }
 0x333   : > { %1899 = vst [vmem:[%s3250_s30 + $0x70] sm:$0xff] %v1879_v44  ;;  %1863 = vst [vmem:[#allocation3 + $0xf0] sm:$0xff] %v1830_v45 }
 0x334   : > { %1864 = vst [vmem:[#allocation3 + $0xf8] sm:$0xff] %v1831_v46  ;;  %1900 = vst [vmem:[%s3250_s30 + $0x78] sm:$0xff] %v1880_v47 }
 0x335 PF: > { %1935 = sbr.rel (%p2390_p9) target bundleno = 859 (0x35b), region = 92  ;;  %s2049_s11 = sshra.s32 (!%p2390_p9), %s2399_s20, 4  ;;  %v1970_v51 = vld [vmem:[#allocation3 + $0x8] sm:$0xff] (!%p2390_p9)  ;;  %v1971_v56 = vld [vmem:[#allocation3 + $0x10] sm:$0xff] (!%p2390_p9)  ;;  %v1972_v57 = vld [vmem:[#allocation3 + $0x18] sm:$0xff] (!%p2390_p9) }
 0x336   : > { %s2403_s21 = sshll.u32 (!%p2390_p9), %s2049_s11, 3  ;;  %v1940_v58 = vld [vmem:[#allocation13 + $0x20] sm:$0xff] (!%p2390_p9)  ;;  %v1941_v61 = vld [vmem:[#allocation13 + $0x28] sm:$0xff] (!%p2390_p9)  ;;  %v1942_v3 = vld [vmem:[#allocation13 + $0x30] sm:$0xff] (!%p2390_p9)  ;;  %p2404_p0 = scmp.ne.s32.totalorder (!%p2390_p9), %s3029_s15, 4 }
 0x337   : > { %v1973_v62 = vld [vmem:[#allocation3 + $0x20] sm:$0xff] (!%p2390_p9)  ;;  %v1974_v63 = vld [vmem:[#allocation3 + $0x28] sm:$0xff] (!%p2390_p9)  ;;  %v1943_v4 = vld [vmem:[#allocation13 + $0x38] sm:$0xff] (!%p2390_p9)  ;;  %s3290_s9 = scalar_lea.vmem (!%p2390_p9), [#allocation2], %s2403_s21 }
 0x338   : > { %v3282_v1 = vadd.f32 (!%p2390_p9), %v1973_v62, %v1940_v58  ;;  %v3284_v2 = vadd.f32 (!%p2390_p9), %v1974_v63, %v1941_v61  ;;  %v1975_v5 = vld [vmem:[#allocation3 + $0x30] sm:$0xff] (!%p2390_p9)  ;;  %v1976_v7 = vld [vmem:[#allocation3 + $0x38] sm:$0xff] (!%p2390_p9)  ;;  %v1944_v9 = vld [vmem:[#allocation13 + $0x40] sm:$0xff] (!%p2390_p9) }
 0x339   : > { %v1936_v48 = vld [vmem:[#allocation13] sm:$0xff] (!%p2390_p9)  ;;  %v3288_v8 = vadd.f32 (!%p2390_p9), %v1975_v5, %v1942_v3  ;;  %v1945_v10 = vld [vmem:[#allocation13 + $0x48] sm:$0xff] (!%p2390_p9)  ;;  %v3295_v12 = vadd.f32 (!%p2390_p9), %v1976_v7, %v1943_v4  ;;  %v1946_v15 = vld [vmem:[#allocation13 + $0x50] sm:$0xff] (!%p2390_p9) }
 0x33a   : > { %v1937_v49 = vld [vmem:[#allocation13 + $0x8] sm:$0xff] (!%p2390_p9)  ;;  %v2035_v11 = vpack.c.bf16 (!%p2390_p9), %v3284_v2, %v3282_v1  ;;  %v1977_v13 = vld [vmem:[#allocation3 + $0x40] sm:$0xff] (!%p2390_p9)  ;;  %v1947_v18 = vld [vmem:[#allocation13 + $0x58] sm:$0xff] (!%p2390_p9) }
 0x33b   : > { %v1969_v50 = vld [vmem:[#allocation3] sm:$0xff] (!%p2390_p9)  ;;  %v1938_v53 = vld [vmem:[#allocation13 + $0x10] sm:$0xff] (!%p2390_p9)  ;;  %v3274_v55 = vadd.f32 (!%p2390_p9), %v1970_v51, %v1937_v49  ;;  %v1978_v14 = vld [vmem:[#allocation3 + $0x48] sm:$0xff] (!%p2390_p9)  ;;  %v3298_v16 = vadd.f32 (!%p2390_p9), %v1977_v13, %v1944_v9  ;;  %v2036_v21 = vpack.c.bf16 (!%p2390_p9), %v3295_v12, %v3288_v8 }
 0x33c   : > { %v3272_v52 = vadd.f32 %v1969_v50, %v1936_v48  ;;  %v1939_v54 = vld [vmem:[#allocation13 + $0x18] sm:$0xff]  ;;  %v3276_v59 = vadd.f32 %v1971_v56, %v1938_v53  ;;  %v3300_v17 = vadd.f32 %v1978_v14, %v1945_v10  ;;  %v1979_v19 = vld [vmem:[#allocation3 + $0x50] sm:$0xff]  ;;  %2055 = vst [vmem:[%s3290_s9 + $0x10] sm:$0xff] %v2035_v11  ;;  %v1948_v24 = vld [vmem:[#allocation13 + $0x60] sm:$0xff] }
 0x33d   : > { %v3278_v60 = vadd.f32 %v1972_v57, %v1939_v54  ;;  %v1980_v20 = vld [vmem:[#allocation3 + $0x58] sm:$0xff]  ;;  %v3305_v22 = vadd.f32 %v1979_v19, %v1946_v15  ;;  %v1949_v25 = vld [vmem:[#allocation13 + $0x68] sm:$0xff]  ;;  %v1981_v26 = vld [vmem:[#allocation3 + $0x60] sm:$0xff]  ;;  %2056 = vst [vmem:[%s3290_s9 + $0x18] sm:$0xff] %v2036_v21 }
 0x33e   : > { %v2033_v0 = vpack.c.bf16 %v3274_v55, %v3272_v52  ;;  %v3307_v23 = vadd.f32 %v1980_v20, %v1947_v18  ;;  %v2037_v27 = vpack.c.bf16 %v3300_v17, %v3298_v16  ;;  %v1982_v28 = vld [vmem:[#allocation3 + $0x68] sm:$0xff]  ;;  %v3311_v29 = vadd.f32 %v1981_v26, %v1948_v24  ;;  %v1950_v30 = vld [vmem:[#allocation13 + $0x70] sm:$0xff]  ;;  %v1951_v31 = vld [vmem:[#allocation13 + $0x78] sm:$0xff]  ;;  %2073 = vst [vmem:[#allocation13] sm:$0xff] (!%p2404_p0), %v3272_v52 }
 0x33f   : > { %v2034_v6 = vpack.c.bf16 %v3278_v60, %v3276_v59  ;;  %v3316_v33 = vadd.f32 %v1982_v28, %v1949_v25  ;;  %v1983_v34 = vld [vmem:[#allocation3 + $0x70] sm:$0xff]  ;;  %v1984_v35 = vld [vmem:[#allocation3 + $0x78] sm:$0xff]  ;;  %v1952_v36 = vld [vmem:[#allocation13 + $0x80] sm:$0xff]  ;;  %2074 = vst [vmem:[#allocation13 + $0x8] sm:$0xff] (!%p2404_p0), %v3274_v55 }
 0x340   : > { %2053 = vst [vmem:[%s3290_s9] sm:$0xff] %v2033_v0  ;;  %v2038_v32 = vpack.c.bf16 %v3307_v23, %v3305_v22  ;;  %2057 = vst [vmem:[%s3290_s9 + $0x20] sm:$0xff] %v2037_v27  ;;  %v3319_v37 = vadd.f32 %v1983_v34, %v1950_v30  ;;  %v3321_v38 = vadd.f32 %v1984_v35, %v1951_v31  ;;  %v1953_v39 = vld [vmem:[#allocation13 + $0x88] sm:$0xff]  ;;  %v1985_v40 = vld [vmem:[#allocation3 + $0x80] sm:$0xff] }
 0x341   : > { %2054 = vst [vmem:[%s3290_s9 + $0x8] sm:$0xff] %v2034_v6  ;;  %v1986_v41 = vld [vmem:[#allocation3 + $0x88] sm:$0xff]  ;;  %v2039_v42 = vpack.c.bf16 %v3316_v33, %v3311_v29  ;;  %v3326_v43 = vadd.f32 %v1985_v40, %v1952_v36  ;;  %v1954_v45 = vld [vmem:[#allocation13 + $0x90] sm:$0xff]  ;;  %v1955_v46 = vld [vmem:[#allocation13 + $0x98] sm:$0xff] }
 0x342   : > { %2058 = vst [vmem:[%s3290_s9 + $0x28] sm:$0xff] %v2038_v32  ;;  %v3328_v44 = vadd.f32 %v1986_v41, %v1953_v39  ;;  %v1987_v47 = vld [vmem:[#allocation3 + $0x90] sm:$0xff]  ;;  %v2040_v48 = vpack.c.bf16 %v3321_v38, %v3319_v37  ;;  %v1988_v49 = vld [vmem:[#allocation3 + $0x98] sm:$0xff]  ;;  %v1956_v51 = vld [vmem:[#allocation13 + $0xa0] sm:$0xff] }
 0x343   : > { %v3332_v50 = vadd.f32 %v1987_v47, %v1954_v45  ;;  %v1957_v53 = vld [vmem:[#allocation13 + $0xa8] sm:$0xff]  ;;  %2059 = vst [vmem:[%s3290_s9 + $0x30] sm:$0xff] %v2039_v42  ;;  %v3337_v56 = vadd.f32 %v1988_v49, %v1955_v46  ;;  %v1989_v57 = vld [vmem:[#allocation3 + $0xa0] sm:$0xff]  ;;  %v1958_v61 = vld [vmem:[#allocation13 + $0xb0] sm:$0xff] }
 0x344   : > { %v2041_v54 = vpack.c.bf16 %v3328_v44, %v3326_v43  ;;  %v1990_v58 = vld [vmem:[#allocation3 + $0xa8] sm:$0xff]  ;;  %2060 = vst [vmem:[%s3290_s9 + $0x38] sm:$0xff] %v2040_v48  ;;  %v3340_v62 = vadd.f32 %v1989_v57, %v1956_v51  ;;  %v1959_v0 = vld [vmem:[#allocation13 + $0xb8] sm:$0xff]  ;;  %v1991_v3 = vld [vmem:[#allocation3 + $0xb0] sm:$0xff] }
 0x345   : > { %v3342_v63 = vadd.f32 %v1990_v58, %v1957_v53  ;;  %v1992_v4 = vld [vmem:[#allocation3 + $0xb8] sm:$0xff]  ;;  %v2042_v5 = vpack.c.bf16 %v3337_v56, %v3332_v50  ;;  %v2023_v6 = vadd.f32 %v1991_v3, %v1958_v61  ;;  %v1960_v9 = vld [vmem:[#allocation13 + $0xc0] sm:$0xff]  ;;  %v1961_v10 = vld [vmem:[#allocation13 + $0xc8] sm:$0xff]  ;;  %2075 = vst [vmem:[#allocation13 + $0x10] sm:$0xff] (!%p2404_p0), %v3276_v59 }
 0x346   : > { %2061 = vst [vmem:[%s3290_s9 + $0x40] sm:$0xff] %v2041_v54  ;;  %v2024_v7 = vadd.f32 %v1992_v4, %v1959_v0  ;;  %v1993_v11 = vld [vmem:[#allocation3 + $0xc0] sm:$0xff]  ;;  %v1994_v14 = vld [vmem:[#allocation3 + $0xc8] sm:$0xff]  ;;  %v1962_v18 = vld [vmem:[#allocation13 + $0xd0] sm:$0xff] }
 0x347   : > { %v2043_v13 = vpack.c.bf16 %v3342_v63, %v3340_v62  ;;  %v2025_v15 = vadd.f32 %v1993_v11, %v1960_v9  ;;  %v1963_v19 = vld [vmem:[#allocation13 + $0xd8] sm:$0xff]  ;;  %2062 = vst [vmem:[%s3290_s9 + $0x48] sm:$0xff] %v2042_v5  ;;  %v2026_v21 = vadd.f32 %v1994_v14, %v1961_v10  ;;  %v1995_v24 = vld [vmem:[#allocation3 + $0xd0] sm:$0xff]  ;;  %v1964_v26 = vld [vmem:[#allocation13 + $0xe0] sm:$0xff] }
 0x348   : > { %v2044_v20 = vpack.c.bf16 %v2024_v7, %v2023_v6  ;;  %v1996_v25 = vld [vmem:[#allocation3 + $0xd8] sm:$0xff]  ;;  %v2027_v27 = vadd.f32 %v1995_v24, %v1962_v18  ;;  %v1965_v30 = vld [vmem:[#allocation13 + $0xe8] sm:$0xff]  ;;  %v1997_v31 = vld [vmem:[#allocation3 + $0xe0] sm:$0xff]  ;;  %2076 = vst [vmem:[#allocation13 + $0x18] sm:$0xff] (!%p2404_p0), %v3278_v60 }
 0x349   : > { %2063 = vst [vmem:[%s3290_s9 + $0x50] sm:$0xff] %v2043_v13  ;;  %v2028_v28 = vadd.f32 %v1996_v25, %v1963_v19  ;;  %v1998_v32 = vld [vmem:[#allocation3 + $0xe8] sm:$0xff]  ;;  %v2045_v34 = vpack.c.bf16 %v2026_v21, %v2025_v15  ;;  %v2029_v35 = vadd.f32 %v1997_v31, %v1964_v26  ;;  %v1966_v39 = vld [vmem:[#allocation13 + $0xf0] sm:$0xff]  ;;  %v1967_v40 = vld [vmem:[#allocation13 + $0xf8] sm:$0xff]  ;;  %2072 = sbr.rel (%p2404_p0) target bundleno = 859 (0x35b), region = 96 }
 0x34a   : > { %2064 = vst [vmem:[%s3290_s9 + $0x58] sm:$0xff] %v2044_v20  ;;  %v2030_v36 = vadd.f32 %v1998_v32, %v1965_v30  ;;  %v1999_v41 = vld [vmem:[#allocation3 + $0xf0] sm:$0xff]  ;;  %v2000_v45 = vld [vmem:[#allocation3 + $0xf8] sm:$0xff]  ;;  %2077 = vst [vmem:[#allocation13 + $0x20] sm:$0xff] (!%p2404_p0), %v3282_v1 }
 0x34b   : > { %v2046_v42 = vpack.c.bf16 %v2028_v28, %v2027_v27  ;;  %v2031_v46 = vadd.f32 %v1999_v41, %v1966_v39  ;;  %2065 = vst [vmem:[%s3290_s9 + $0x60] sm:$0xff] %v2045_v34  ;;  %v2032_v48 = vadd.f32 %v2000_v45, %v1967_v40  ;;  %2078 = vst [vmem:[#allocation13 + $0x28] sm:$0xff] (!%p2404_p0), %v3284_v2 }
 0x34c   : > { %v2047_v47 = vpack.c.bf16 %v2030_v36, %v2029_v35  ;;  %2079 = vst [vmem:[#allocation13 + $0x30] sm:$0xff] (!%p2404_p0), %v3288_v8  ;;  %2080 = vst [vmem:[#allocation13 + $0x38] sm:$0xff] (!%p2404_p0), %v3295_v12 }
 0x34d   : > { %2066 = vst [vmem:[%s3290_s9 + $0x68] sm:$0xff] %v2046_v42  ;;  %v2048_v49 = vpack.c.bf16 %v2032_v48, %v2031_v46  ;;  %2081 = vst [vmem:[#allocation13 + $0x40] sm:$0xff] (!%p2404_p0), %v3298_v16 }
 0x34e   : > { %2067 = vst [vmem:[%s3290_s9 + $0x70] sm:$0xff] %v2047_v47  ;;  %2082 = vst [vmem:[#allocation13 + $0x48] sm:$0xff] (!%p2404_p0), %v3300_v17 }
 0x34f   : > { %2068 = vst [vmem:[%s3290_s9 + $0x78] sm:$0xff] %v2048_v49  ;;  %2083 = vst [vmem:[#allocation13 + $0x50] sm:$0xff] (!%p2404_p0), %v3305_v22 }
 0x350   : > { %2084 = vst [vmem:[#allocation13 + $0x58] sm:$0xff] %v3307_v23  ;;  %2085 = vst [vmem:[#allocation13 + $0x60] sm:$0xff] %v3311_v29 }
 0x351   : > { %2086 = vst [vmem:[#allocation13 + $0x68] sm:$0xff] %v3316_v33  ;;  %2087 = vst [vmem:[#allocation13 + $0x70] sm:$0xff] %v3319_v37 }
 0x352   : > { %2088 = vst [vmem:[#allocation13 + $0x78] sm:$0xff] %v3321_v38  ;;  %2089 = vst [vmem:[#allocation13 + $0x80] sm:$0xff] %v3326_v43 }
 0x353   : > { %2090 = vst [vmem:[#allocation13 + $0x88] sm:$0xff] %v3328_v44  ;;  %2091 = vst [vmem:[#allocation13 + $0x90] sm:$0xff] %v3332_v50 }
 0x354   : > { %2092 = vst [vmem:[#allocation13 + $0x98] sm:$0xff] %v3337_v56  ;;  %2093 = vst [vmem:[#allocation13 + $0xa0] sm:$0xff] %v3340_v62 }
 0x355   : > { %2094 = vst [vmem:[#allocation13 + $0xa8] sm:$0xff] %v3342_v63  ;;  %2095 = vst [vmem:[#allocation13 + $0xb0] sm:$0xff] %v2023_v6 }
 0x356   : > { %2096 = vst [vmem:[#allocation13 + $0xb8] sm:$0xff] %v2024_v7  ;;  %2097 = vst [vmem:[#allocation13 + $0xc0] sm:$0xff] %v2025_v15 }
 0x357   : > { %2098 = vst [vmem:[#allocation13 + $0xc8] sm:$0xff] %v2026_v21  ;;  %2099 = vst [vmem:[#allocation13 + $0xd0] sm:$0xff] %v2027_v27 }
 0x358   : > { %2100 = vst [vmem:[#allocation13 + $0xd8] sm:$0xff] %v2028_v28  ;;  %2101 = vst [vmem:[#allocation13 + $0xe0] sm:$0xff] %v2029_v35 }
 0x359   : > { %2102 = vst [vmem:[#allocation13 + $0xe8] sm:$0xff] %v2030_v36  ;;  %2103 = vst [vmem:[#allocation13 + $0xf0] sm:$0xff] %v2031_v46 }
 0x35a   : > { %2104 = vst [vmem:[#allocation13 + $0xf8] sm:$0xff] %v2032_v48 }
 0x35b PF: > { %p2711_p1 = scmp.eq.s32.totalorder %s3091_s18, 4  ;;  %s3047_s15 = smov [#allocation13]  }
 0x35c   : > { %s2121_s10 = sshll.u32 %s3047_s15, 4  ;;  %s2122_s10 = int_to_ptr.vmem [resolvable:$true] %s2121_s10 }
 0x35d   : > { %s2973_s13 = scalar_lea.vmem %s2122_s10, 4096  ;;  %s2979_s12 = scalar_lea.vmem %s2122_s10, 8192 }
 0x35e   : > { %p2974_p4 = scmp.ne.s32.totalorder %s2122_s10, %s2973_s13  ;;  %p2980_p7 = scmp.lt.s32.totalorder %s2122_s10, %s2122_s10 }
 0x35f   : > { %p2981_p5 = scmp.lt.s32.totalorder %s2979_s12, %s2973_s13 }
 0x360   : > { %p2975_p6 = pnand %p2974_p4, %p2711_p1 }
 0x361   : > { %p2982_p8 = por %p2981_p5, %p2980_p7 }
 0x362   : > { %p2976_p3 = pneg %p2975_p6 }
 0x364   : > { %p2983_p2 = pnand %p2982_p8, %p2976_p3 }
 0x366   : > { %2986 = shalt.err (!%p2983_p2)
}
 0x367   : > { %s2987_s27 = scalar_lea.hbm %s3414_s4, 4096 }
 0x368   : > { %p2988_p9 = scmp.ne.s32.totalorder %s3414_s4, %s2987_s27  ;;  %p2993_p12 = scmp.lt.u32.totalorder %s2987_s27, %s3414_s4 }
 0x36a   : > { %p2989_p10 = pnand %p2988_p9, %p2711_p1 }
 0x36c   : > { %p2990_p11 = pneg %p2989_p10 }
 0x36e   : > { %p2995_p13 = pnand %p2993_p12, %p2990_p11 }
 0x370   : > { %2998 = shalt.err (!%p2995_p13)
}
 0x371   : > { %s3048_s22 = smov 128   ;;  %s3049_s6 = smov 8  }
 0x372   : > { %2682 = dma.vmem_to_hbm [thread:$0]  (%p2711_p1), %s2122_s10, 4096, %s3414_s4, [#allocation7], %s3048_s22, %s3048_s22, %s3049_s6  }
 0x373 PF: > { %p2712_p0 = scmp.ge.s32.totalorder %s3037_s17, 2  ;;  %p2713_p4 = scmp.eq.s32.totalorder %s2296_s19, 4 }
 0x375   : > { %p2699_p6 = pnand %p2713_p4, %p2712_p0 }
 0x377   : > { %3024 = dma.done.wait (!%p2699_p6), [#allocation7], 4096  }
 0x378   : > { %3026 = vsyncadd (!%p2699_p6), [#allocation7], 4294963200  ;;  %s26_s17 = sadd.s32 1, %s3037_s17   ;;  %s3420_s15 = smov %s3033_s16 }
 0x379   : > { %p23_p3 = scmp.ge.s32.totalorder %s26_s17, 7   ;;  %s3421_s16 = smov %s3423_s14 }
 0x37b   :  { %25 = sbr.rel (!%p23_p3) target bundleno = 9 (0x9), region = 169 }
 0x382   :  { %2142 = vsyncpa [#allocation6], 1 }
 0x383   :  { %2144 = vsyncpa [#allocation6 + $0x1], 1 }
 0x384   :  { %2145 = vsyncpa [#allocation9], 1 }
 0x385   :  { %2147 = vsyncpa [#allocation9 + $0x1], 1 }
 0x386   :  { %2148 = vsyncpa [#allocation12], 1 }
 0x387   :  { %2150 = vsyncpa [#allocation12 + $0x1], 1 }
 0x388   :  { %2151 = vsyncpa [#allocation7], 1 }
 0x389   :  { %2153 = vsyncpa [#allocation7 + $0x1], 1 }

</bundles_post_ra>
